<compile_context>
chip_gen: v7x
topology: tpu7x:2x2x1
jax: 0.10.0
libtpu: 0.0.40
codegen_flags: <defaults>
</compile_context>

<pallas_src>
import math

import jax
import jax.numpy as jnp
from jax.experimental import pallas as pl
from jax.experimental.pallas import tpu as pltpu

# ----------------------- synthetic "configs" -----------------------
B        = 2      # batch
SEQ_LEN  = 8      # configs.seq_len
PRED_LEN = 8      # configs.pred_len
ENC_IN   = 4      # configs.enc_in
C_OUT    = 4      # configs.c_out
D_MODEL  = 32     # configs.d_model
N_HEADS  = 4      # configs.n_heads
D_FF     = 64     # configs.d_ff
E_LAYERS = 2      # configs.e_layers
EPS      = 1e-5   # both series-norm eps and LayerNorm eps

DH = D_MODEL // N_HEADS
BL = B * SEQ_LEN
BP = B * PRED_LEN

# de-normalization broadcasts (1, ENC_IN) stats onto (PRED_LEN, C_OUT) output
assert C_OUT == ENC_IN, "de-normalization requires c_out == enc_in"
assert D_MODEL % N_HEADS == 0
assert SEQ_LEN % 8 == 0, "flattened batch rows should stay sublane-aligned"


# ----------------------------- kernel ------------------------------
def _layer_norm(x, gamma, beta):
    mu = jnp.mean(x, axis=-1, keepdims=True)
    xc = x - mu
    var = jnp.mean(xc * xc, axis=-1, keepdims=True)
    return xc * jax.lax.rsqrt(var + EPS) * gamma + beta


def fused_forward_kernel(x_ref, w_tok_ref, pe_ref, mask_ref,
                         wqkv_ref, bqkv_ref, wo_ref, bo_ref,
                         w1_ref, b1_ref, w2_ref, b2_ref,
                         g1_ref, be1_ref, g2_ref, be2_ref,
                         gf_ref, bf_ref,
                         wp_ref, bp_ref, wt_ref, bt_ref,
                         o_ref):
    """Whole forward pass for the full batch in one gridless invocation."""
    # -------- per-series normalization + circular conv taps (per batch) --------
    # Cheap VPU/XLU work; all heavy matmuls below run on the flattened batch.
    x_cats, mus, sds = [], [], []
    for b in range(B):                                   # static unroll (tiny batch)
        x = x_ref[b]                                     # (L, C_in)
        mu = jnp.mean(x, axis=0, keepdims=True)          # (1, C_in)
        xc = x - mu
        var = jnp.mean(xc * xc, axis=0, keepdims=True)   # unbiased=False
        sd = jnp.sqrt(var + EPS)
        xn = xc * pl.reciprocal(sd, approx=True)
        x_prev = pltpu.roll(xn, shift=1, axis=0)         # x[t-1]  (circular)
        x_next = pltpu.roll(xn, shift=SEQ_LEN - 1, axis=0)  # x[t+1] (circular)
        x_cats.append(jnp.concatenate([x_prev, xn, x_next], axis=-1))  # (L, 3*C_in)
        mus.append(mu)
        sds.append(sd)
    x_cat = jnp.concatenate(x_cats, axis=0)              # (B*L, 3*C_in)

    # -------- DataEmbedding: circular k=3 conv folded to one matmul + PE --------
    h = (jnp.dot(x_cat, w_tok_ref[...], preferred_element_type=jnp.float32)
         + pe_ref[...])                                  # (B*L, D)

    mask = mask_ref[...]                                 # (B*L, B*L) block-diag bias

    # -------- encoder layers (weights stacked on leading E_LAYERS axis) --------
    for l in range(E_LAYERS):                            # static unroll
        # packed QKV projection: one (B*L,D) @ (D,3D) matmul
        # (1/sqrt(d_head) scale is already folded into the Q weight slice)
        qkv = (jnp.dot(h, wqkv_ref[l], preferred_element_type=jnp.float32)
               + bqkv_ref[l])                            # (B*L, 3D)
        wo = wo_ref[l]                                   # (D, D)

        head_acc = None
        for hh in range(N_HEADS):                        # static unroll
            q = qkv[:, hh * DH:(hh + 1) * DH]
            k = qkv[:, D_MODEL + hh * DH:D_MODEL + (hh + 1) * DH]
            v = qkv[:, 2 * D_MODEL + hh * DH:2 * D_MODEL + (hh + 1) * DH]
            # batch-fused scores: cross-batch entries masked to -1e30
            s = jax.lax.dot_general(q, k, (((1,), (1,)), ((), ())),
                                    preferred_element_type=jnp.float32) + mask
            s = s - jnp.max(s, axis=-1, keepdims=True)
            p = jnp.exp(s)
            p = p * pl.reciprocal(jnp.sum(p, axis=-1, keepdims=True), approx=True)
            ctx = jnp.dot(p, v, preferred_element_type=jnp.float32)       # (B*L, DH)
            # fold "concat heads + W_o" into per-head row-block matmuls
            contrib = jnp.dot(ctx, wo[hh * DH:(hh + 1) * DH, :],
                              preferred_element_type=jnp.float32)         # (B*L, D)
            head_acc = contrib if head_acc is None else head_acc + contrib
        attn = head_acc + bo_ref[l]

        x1 = _layer_norm(h + attn, g1_ref[l], be1_ref[l])
        y = jnp.dot(x1, w1_ref[l], preferred_element_type=jnp.float32) + b1_ref[l]
        y = jnp.maximum(y, 0.0)                          # activation='relu'
        y = jnp.dot(y, w2_ref[l], preferred_element_type=jnp.float32) + b2_ref[l]
        h = _layer_norm(x1 + y, g2_ref[l], be2_ref[l])

    # -------- final encoder LayerNorm --------
    h = _layer_norm(h, gf_ref[...], bf_ref[...])

    # -------- output head (feature proj + block-diag time proj) --------
    y = jnp.dot(h, wp_ref[...], preferred_element_type=jnp.float32) + bp_ref[...]   # (B*L, C_out)
    o = jnp.dot(wt_ref[...], y, preferred_element_type=jnp.float32) + bt_ref[...]   # (B*P, C_out)

    # -------- de-normalization + per-batch store --------
    for b in range(B):
        o_ref[b] = (o[b * PRED_LEN:(b + 1) * PRED_LEN] * sds[b] + mus[b])


# --------------------------- pallas glue ----------------------------
def transformer_forward(packed, x_enc):
    # Single gridless pallas_call: every operand is a full array resident in VMEM.
    return pl.pallas_call(
        fused_forward_kernel,
        out_shape=jax.ShapeDtypeStruct((B, PRED_LEN, C_OUT), jnp.float32),
    )(x_enc,
      packed['w_tok'], packed['pe_flat'], packed['mask'],
      packed['wqkv'], packed['bqkv'], packed['wo'], packed['bo'],
      packed['w1'], packed['b1'], packed['w2'], packed['b2'],
      packed['g1'], packed['be1'], packed['g2'], packed['be2'],
      packed['gF'], packed['bF'],
      packed['wp'], packed['bp'], packed['wt_blk'], packed['bt_flat'])


# --------------------------- parameters -----------------------------
def init_params(key):
    ks = jax.random.split(key, 8)

    def nrm(k, shape, fan_in):
        return jax.random.normal(k, shape, dtype=jnp.float32) / math.sqrt(float(fan_in))

    # TokenEmbedding: Conv1d(ENC_IN -> D_MODEL, k=3, circular, no bias) folded to (3*ENC_IN, D)
    w_tok = nrm(ks[0], (3 * ENC_IN, D_MODEL), 3 * ENC_IN)

    # sinusoidal positional embedding
    pos = jnp.arange(SEQ_LEN, dtype=jnp.float32)[:, None]
    div = jnp.exp(jnp.arange(0, D_MODEL, 2, dtype=jnp.float32)
                  * (-math.log(10000.0) / D_MODEL))
    pe = jnp.zeros((SEQ_LEN, D_MODEL), dtype=jnp.float32)
    pe = pe.at[:, 0::2].set(jnp.sin(pos * div))
    pe = pe.at[:, 1::2].set(jnp.cos(pos * div))

    params = dict(
        w_tok=w_tok, pe=pe,
        # per-layer weights stacked on a leading E_LAYERS axis; QKV packed (D, 3D)
        wqkv=nrm(ks[1], (E_LAYERS, D_MODEL, 3 * D_MODEL), D_MODEL),
        bqkv=jnp.zeros((E_LAYERS, 1, 3 * D_MODEL), jnp.float32),
        wo=nrm(ks[2], (E_LAYERS, D_MODEL, D_MODEL), D_MODEL),
        bo=jnp.zeros((E_LAYERS, 1, D_MODEL), jnp.float32),
        w1=nrm(ks[3], (E_LAYERS, D_MODEL, D_FF), D_MODEL),
        b1=jnp.zeros((E_LAYERS, 1, D_FF), jnp.float32),
        w2=nrm(ks[4], (E_LAYERS, D_FF, D_MODEL), D_FF),
        b2=jnp.zeros((E_LAYERS, 1, D_MODEL), jnp.float32),
        g1=jnp.ones((E_LAYERS, 1, D_MODEL), jnp.float32),
        be1=jnp.zeros((E_LAYERS, 1, D_MODEL), jnp.float32),
        g2=jnp.ones((E_LAYERS, 1, D_MODEL), jnp.float32),
        be2=jnp.zeros((E_LAYERS, 1, D_MODEL), jnp.float32),
        gF=jnp.ones((1, D_MODEL), jnp.float32),
        bF=jnp.zeros((1, D_MODEL), jnp.float32),
        # OutputEmbedding (see TODO(synk)): Linear(D->C_OUT) then Linear(SEQ_LEN->PRED_LEN)
        wp=nrm(ks[5], (D_MODEL, C_OUT), D_MODEL),
        bp=jnp.zeros((1, C_OUT), jnp.float32),
        wt=nrm(ks[6], (PRED_LEN, SEQ_LEN), SEQ_LEN),
        bt=jnp.zeros((PRED_LEN, 1), jnp.float32),
    )
    return params


def pack_params(p):
    """One-time, wrapper-side constant folding so the jitted forward is a single pallas_call."""
    scale = 1.0 / math.sqrt(DH)
    # fold the attention scale into the Q slice of the packed QKV projection
    wqkv = p['wqkv'].at[:, :, :D_MODEL].multiply(scale)
    bqkv = p['bqkv'].at[:, :, :D_MODEL].multiply(scale)
    # positional embedding tiled over the flattened batch rows (batch-major)
    pe_flat = jnp.tile(p['pe'], (B, 1))                              # (B*L, D)
    # block-diagonal additive attention bias: 0 within a batch, -1e30 across batches
    bid = jnp.repeat(jnp.arange(B), SEQ_LEN)
    mask = jnp.where(bid[:, None] == bid[None, :], 0.0, -1e30).astype(jnp.float32)
    # block-diagonal time projection so the whole batch is one matmul
    wt_blk = jnp.kron(jnp.eye(B, dtype=jnp.float32), p['wt'])        # (B*P, B*L)
    bt_flat = jnp.tile(p['bt'], (B, 1))                              # (B*P, 1)
    packed = dict(p)
    packed.update(wqkv=wqkv, bqkv=bqkv, pe_flat=pe_flat, mask=mask,
                  wt_blk=wt_blk, bt_flat=bt_flat)
    return packed


# ------------------------------ main --------------------------------
if __name__ == "__main__":
    key = jax.random.PRNGKey(0)
    pkey, xkey = jax.random.split(key)
    params = init_params(pkey)
    packed = pack_params(params)
    x_enc = jax.random.normal(xkey, (B, SEQ_LEN, ENC_IN), dtype=jnp.float32)

    fwd = jax.jit(lambda x: transformer_forward(packed, x))
    out = fwd(x_enc)
    out = jax.block_until_ready(out)
    assert out.shape == (B, PRED_LEN, C_OUT), out.shape
    assert jnp.all(jnp.isfinite(out))
    print("KERNEL_OK")
</pallas_src>

<mosaic_0001>
module attributes {stable_mosaic.version = 11 : i64} {
  func.func @fused_forward_kernel(%arg0: memref<2x8x4xf32, #tpu.memory_space<vmem>>, %arg1: memref<12x32xf32, #tpu.memory_space<vmem>>, %arg2: memref<16x32xf32, #tpu.memory_space<vmem>>, %arg3: memref<16x16xf32, #tpu.memory_space<vmem>>, %arg4: memref<2x32x96xf32, #tpu.memory_space<vmem>>, %arg5: memref<2x1x96xf32, #tpu.memory_space<vmem>>, %arg6: memref<2x32x32xf32, #tpu.memory_space<vmem>>, %arg7: memref<2x1x32xf32, #tpu.memory_space<vmem>>, %arg8: memref<2x32x64xf32, #tpu.memory_space<vmem>>, %arg9: memref<2x1x64xf32, #tpu.memory_space<vmem>>, %arg10: memref<2x64x32xf32, #tpu.memory_space<vmem>>, %arg11: memref<2x1x32xf32, #tpu.memory_space<vmem>>, %arg12: memref<2x1x32xf32, #tpu.memory_space<vmem>>, %arg13: memref<2x1x32xf32, #tpu.memory_space<vmem>>, %arg14: memref<2x1x32xf32, #tpu.memory_space<vmem>>, %arg15: memref<2x1x32xf32, #tpu.memory_space<vmem>>, %arg16: memref<1x32xf32, #tpu.memory_space<vmem>>, %arg17: memref<1x32xf32, #tpu.memory_space<vmem>>, %arg18: memref<32x4xf32, #tpu.memory_space<vmem>>, %arg19: memref<1x4xf32, #tpu.memory_space<vmem>>, %arg20: memref<16x16xf32, #tpu.memory_space<vmem>>, %arg21: memref<16x1xf32, #tpu.memory_space<vmem>>, %arg22: memref<2x8x4xf32, #tpu.memory_space<vmem>>) attributes {dimension_semantics = [], scalar_prefetch = 0 : i64, scratch_operands = 0 : i64, tpu.core_type = #tpu.core_type<tc>} {
    %c0 = arith.constant 0 : index
    %c0_0 = arith.constant 0 : index
    %c0_1 = arith.constant 0 : index
    %0 = vector.load %arg0[%c0, %c0_0, %c0_1] : memref<2x8x4xf32, #tpu.memory_space<vmem>>, vector<1x8x4xf32>
    %1 = vector.shape_cast %0 : vector<1x8x4xf32> to vector<8x4xf32>
    %cst = arith.constant dense<0.000000e+00> : vector<4xf32>
    %2 = vector.multi_reduction <add>, %1, %cst [0] : vector<8x4xf32> to vector<4xf32>
    %3 = vector.shape_cast %2 : vector<4xf32> to vector<1x4xf32>
    %cst_2 = arith.constant 8.000000e+00 : f32
    %4 = vector.broadcast %cst_2 : f32 to vector<1x4xf32>
    %5 = arith.divf %3, %4 : vector<1x4xf32>
    %6 = vector.broadcast %5 : vector<1x4xf32> to vector<8x4xf32>
    %7 = arith.subf %1, %6 : vector<8x4xf32>
    %8 = arith.mulf %7, %7 : vector<8x4xf32>
    %cst_3 = arith.constant dense<0.000000e+00> : vector<4xf32>
    %9 = vector.multi_reduction <add>, %8, %cst_3 [0] : vector<8x4xf32> to vector<4xf32>
    %10 = vector.shape_cast %9 : vector<4xf32> to vector<1x4xf32>
    %cst_4 = arith.constant 8.000000e+00 : f32
    %11 = vector.broadcast %cst_4 : f32 to vector<1x4xf32>
    %12 = arith.divf %10, %11 : vector<1x4xf32>
    %cst_5 = arith.constant 9.99999974E-6 : f32
    %13 = vector.broadcast %cst_5 : f32 to vector<1x4xf32>
    %14 = arith.addf %12, %13 : vector<1x4xf32>
    %15 = math.sqrt %14 : vector<1x4xf32>
    %16 = tpu.reciprocal %15 {approx = true} : vector<1x4xf32> -> vector<1x4xf32>
    %17 = vector.broadcast %16 : vector<1x4xf32> to vector<8x4xf32>
    %18 = arith.mulf %7, %17 : vector<8x4xf32>
    %c1_i32 = arith.constant 1 : i32
    %19 = tpu.dynamic_rotate %18 by %c1_i32 dim 0 : vector<8x4xf32>, i32 -> vector<8x4xf32>
    %c7_i32 = arith.constant 7 : i32
    %20 = tpu.dynamic_rotate %18 by %c7_i32 dim 0 : vector<8x4xf32>, i32 -> vector<8x4xf32>
    %21 = tpu.concatenate %19, %18, %20 in 1 : vector<8x4xf32>, vector<8x4xf32>, vector<8x4xf32> -> vector<8x12xf32>
    %c1 = arith.constant 1 : index
    %c0_6 = arith.constant 0 : index
    %c0_7 = arith.constant 0 : index
    %22 = vector.load %arg0[%c1, %c0_6, %c0_7] : memref<2x8x4xf32, #tpu.memory_space<vmem>>, vector<1x8x4xf32>
    %23 = vector.shape_cast %22 : vector<1x8x4xf32> to vector<8x4xf32>
    %cst_8 = arith.constant dense<0.000000e+00> : vector<4xf32>
    %24 = vector.multi_reduction <add>, %23, %cst_8 [0] : vector<8x4xf32> to vector<4xf32>
    %25 = vector.shape_cast %24 : vector<4xf32> to vector<1x4xf32>
    %cst_9 = arith.constant 8.000000e+00 : f32
    %26 = vector.broadcast %cst_9 : f32 to vector<1x4xf32>
    %27 = arith.divf %25, %26 : vector<1x4xf32>
    %28 = vector.broadcast %27 : vector<1x4xf32> to vector<8x4xf32>
    %29 = arith.subf %23, %28 : vector<8x4xf32>
    %30 = arith.mulf %29, %29 : vector<8x4xf32>
    %cst_10 = arith.constant dense<0.000000e+00> : vector<4xf32>
    %31 = vector.multi_reduction <add>, %30, %cst_10 [0] : vector<8x4xf32> to vector<4xf32>
    %32 = vector.shape_cast %31 : vector<4xf32> to vector<1x4xf32>
    %cst_11 = arith.constant 8.000000e+00 : f32
    %33 = vector.broadcast %cst_11 : f32 to vector<1x4xf32>
    %34 = arith.divf %32, %33 : vector<1x4xf32>
    %cst_12 = arith.constant 9.99999974E-6 : f32
    %35 = vector.broadcast %cst_12 : f32 to vector<1x4xf32>
    %36 = arith.addf %34, %35 : vector<1x4xf32>
    %37 = math.sqrt %36 : vector<1x4xf32>
    %38 = tpu.reciprocal %37 {approx = true} : vector<1x4xf32> -> vector<1x4xf32>
    %39 = vector.broadcast %38 : vector<1x4xf32> to vector<8x4xf32>
    %40 = arith.mulf %29, %39 : vector<8x4xf32>
    %c1_i32_13 = arith.constant 1 : i32
    %41 = tpu.dynamic_rotate %40 by %c1_i32_13 dim 0 : vector<8x4xf32>, i32 -> vector<8x4xf32>
    %c7_i32_14 = arith.constant 7 : i32
    %42 = tpu.dynamic_rotate %40 by %c7_i32_14 dim 0 : vector<8x4xf32>, i32 -> vector<8x4xf32>
    %43 = tpu.concatenate %41, %40, %42 in 1 : vector<8x4xf32>, vector<8x4xf32>, vector<8x4xf32> -> vector<8x12xf32>
    %44 = tpu.concatenate %21, %43 in 0 : vector<8x12xf32>, vector<8x12xf32> -> vector<16x12xf32>
    %c0_15 = arith.constant 0 : index
    %c0_16 = arith.constant 0 : index
    %45 = vector.load %arg1[%c0_15, %c0_16] : memref<12x32xf32, #tpu.memory_space<vmem>>, vector<12x32xf32>
    %cst_17 = arith.constant dense<0.000000e+00> : vector<16x32xf32>
    %46 = tpu.matmul %44, %45, %cst_17 {dimension_numbers = #tpu.dot_dimension_numbers<[1], [0], [0], [1], [0, 0, 1, 1], [], []>} : vector<16x12xf32>, vector<12x32xf32>, vector<16x32xf32> -> vector<16x32xf32>
    %c0_18 = arith.constant 0 : index
    %c0_19 = arith.constant 0 : index
    %47 = vector.load %arg2[%c0_18, %c0_19] : memref<16x32xf32, #tpu.memory_space<vmem>>, vector<16x32xf32>
    %48 = arith.addf %46, %47 : vector<16x32xf32>
    %c0_20 = arith.constant 0 : index
    %c0_21 = arith.constant 0 : index
    %49 = vector.load %arg3[%c0_20, %c0_21] : memref<16x16xf32, #tpu.memory_space<vmem>>, vector<16x16xf32>
    %c0_22 = arith.constant 0 : index
    %c0_23 = arith.constant 0 : index
    %c0_24 = arith.constant 0 : index
    %50 = vector.load %arg4[%c0_22, %c0_23, %c0_24] : memref<2x32x96xf32, #tpu.memory_space<vmem>>, vector<1x32x96xf32>
    %51 = vector.shape_cast %50 : vector<1x32x96xf32> to vector<32x96xf32>
    %cst_25 = arith.constant dense<0.000000e+00> : vector<16x96xf32>
    %52 = tpu.matmul %48, %51, %cst_25 {dimension_numbers = #tpu.dot_dimension_numbers<[1], [0], [0], [1], [0, 0, 1, 1], [], []>} : vector<16x32xf32>, vector<32x96xf32>, vector<16x96xf32> -> vector<16x96xf32>
    %c0_26 = arith.constant 0 : index
    %c0_27 = arith.constant 0 : index
    %c0_28 = arith.constant 0 : index
    %53 = vector.load %arg5[%c0_26, %c0_27, %c0_28] : memref<2x1x96xf32, #tpu.memory_space<vmem>>, vector<1x1x96xf32>
    %54 = vector.shape_cast %53 : vector<1x1x96xf32> to vector<1x96xf32>
    %55 = vector.broadcast %54 : vector<1x96xf32> to vector<16x96xf32>
    %56 = arith.addf %52, %55 : vector<16x96xf32>
    %c0_29 = arith.constant 0 : index
    %c0_30 = arith.constant 0 : index
    %c0_31 = arith.constant 0 : index
    %57 = vector.load %arg6[%c0_29, %c0_30, %c0_31] : memref<2x32x32xf32, #tpu.memory_space<vmem>>, vector<1x32x32xf32>
    %58 = vector.shape_cast %57 : vector<1x32x32xf32> to vector<32x32xf32>
    %59 = vector.extract_strided_slice %56 {offsets = [0, 0], sizes = [16, 8], strides = [1, 1]} : vector<16x96xf32> to vector<16x8xf32>
    %60 = vector.extract_strided_slice %56 {offsets = [0, 32], sizes = [16, 8], strides = [1, 1]} : vector<16x96xf32> to vector<16x8xf32>
    %61 = vector.extract_strided_slice %56 {offsets = [0, 64], sizes = [16, 8], strides = [1, 1]} : vector<16x96xf32> to vector<16x8xf32>
    %cst_32 = arith.constant dense<0.000000e+00> : vector<16x16xf32>
    %62 = tpu.matmul %59, %60, %cst_32 {dimension_numbers = #tpu.dot_dimension_numbers<[1], [1], [0], [0], [0, 0, 1, 0], [], []>} : vector<16x8xf32>, vector<16x8xf32>, vector<16x16xf32> -> vector<16x16xf32>
    %63 = arith.addf %62, %49 : vector<16x16xf32>
    %cst_33 = arith.constant dense<0xFF800000> : vector<16xf32>
    %64 = vector.multi_reduction <maximumf>, %63, %cst_33 [1] : vector<16x16xf32> to vector<16xf32>
    %65 = vector.shape_cast %64 : vector<16xf32> to vector<16x1xf32>
    %66 = vector.broadcast %65 : vector<16x1xf32> to vector<16x16xf32>
    %67 = arith.subf %63, %66 : vector<16x16xf32>
    %68 = math.exp %67 : vector<16x16xf32>
    %cst_34 = arith.constant dense<0.000000e+00> : vector<16xf32>
    %69 = vector.multi_reduction <add>, %68, %cst_34 [1] : vector<16x16xf32> to vector<16xf32>
    %70 = vector.shape_cast %69 : vector<16xf32> to vector<16x1xf32>
    %71 = tpu.reciprocal %70 {approx = true} : vector<16x1xf32> -> vector<16x1xf32>
    %72 = vector.broadcast %71 : vector<16x1xf32> to vector<16x16xf32>
    %73 = arith.mulf %68, %72 : vector<16x16xf32>
    %cst_35 = arith.constant dense<0.000000e+00> : vector<16x8xf32>
    %74 = tpu.matmul %73, %61, %cst_35 {dimension_numbers = #tpu.dot_dimension_numbers<[1], [0], [0], [1], [0, 0, 1, 1], [], []>} : vector<16x16xf32>, vector<16x8xf32>, vector<16x8xf32> -> vector<16x8xf32>
    %75 = vector.extract_strided_slice %58 {offsets = [0, 0], sizes = [8, 32], strides = [1, 1]} : vector<32x32xf32> to vector<8x32xf32>
    %cst_36 = arith.constant dense<0.000000e+00> : vector<16x32xf32>
    %76 = tpu.matmul %74, %75, %cst_36 {dimension_numbers = #tpu.dot_dimension_numbers<[1], [0], [0], [1], [0, 0, 1, 1], [], []>} : vector<16x8xf32>, vector<8x32xf32>, vector<16x32xf32> -> vector<16x32xf32>
    %77 = vector.extract_strided_slice %56 {offsets = [0, 8], sizes = [16, 8], strides = [1, 1]} : vector<16x96xf32> to vector<16x8xf32>
    %78 = vector.extract_strided_slice %56 {offsets = [0, 40], sizes = [16, 8], strides = [1, 1]} : vector<16x96xf32> to vector<16x8xf32>
    %79 = vector.extract_strided_slice %56 {offsets = [0, 72], sizes = [16, 8], strides = [1, 1]} : vector<16x96xf32> to vector<16x8xf32>
    %cst_37 = arith.constant dense<0.000000e+00> : vector<16x16xf32>
    %80 = tpu.matmul %77, %78, %cst_37 {dimension_numbers = #tpu.dot_dimension_numbers<[1], [1], [0], [0], [0, 0, 1, 0], [], []>} : vector<16x8xf32>, vector<16x8xf32>, vector<16x16xf32> -> vector<16x16xf32>
    %81 = arith.addf %80, %49 : vector<16x16xf32>
    %cst_38 = arith.constant dense<0xFF800000> : vector<16xf32>
    %82 = vector.multi_reduction <maximumf>, %81, %cst_38 [1] : vector<16x16xf32> to vector<16xf32>
    %83 = vector.shape_cast %82 : vector<16xf32> to vector<16x1xf32>
    %84 = vector.broadcast %83 : vector<16x1xf32> to vector<16x16xf32>
    %85 = arith.subf %81, %84 : vector<16x16xf32>
    %86 = math.exp %85 : vector<16x16xf32>
    %cst_39 = arith.constant dense<0.000000e+00> : vector<16xf32>
    %87 = vector.multi_reduction <add>, %86, %cst_39 [1] : vector<16x16xf32> to vector<16xf32>
    %88 = vector.shape_cast %87 : vector<16xf32> to vector<16x1xf32>
    %89 = tpu.reciprocal %88 {approx = true} : vector<16x1xf32> -> vector<16x1xf32>
    %90 = vector.broadcast %89 : vector<16x1xf32> to vector<16x16xf32>
    %91 = arith.mulf %86, %90 : vector<16x16xf32>
    %cst_40 = arith.constant dense<0.000000e+00> : vector<16x8xf32>
    %92 = tpu.matmul %91, %79, %cst_40 {dimension_numbers = #tpu.dot_dimension_numbers<[1], [0], [0], [1], [0, 0, 1, 1], [], []>} : vector<16x16xf32>, vector<16x8xf32>, vector<16x8xf32> -> vector<16x8xf32>
    %93 = vector.extract_strided_slice %58 {offsets = [8, 0], sizes = [8, 32], strides = [1, 1]} : vector<32x32xf32> to vector<8x32xf32>
    %cst_41 = arith.constant dense<0.000000e+00> : vector<16x32xf32>
    %94 = tpu.matmul %92, %93, %cst_41 {dimension_numbers = #tpu.dot_dimension_numbers<[1], [0], [0], [1], [0, 0, 1, 1], [], []>} : vector<16x8xf32>, vector<8x32xf32>, vector<16x32xf32> -> vector<16x32xf32>
    %95 = arith.addf %76, %94 : vector<16x32xf32>
    %96 = vector.extract_strided_slice %56 {offsets = [0, 16], sizes = [16, 8], strides = [1, 1]} : vector<16x96xf32> to vector<16x8xf32>
    %97 = vector.extract_strided_slice %56 {offsets = [0, 48], sizes = [16, 8], strides = [1, 1]} : vector<16x96xf32> to vector<16x8xf32>
    %98 = vector.extract_strided_slice %56 {offsets = [0, 80], sizes = [16, 8], strides = [1, 1]} : vector<16x96xf32> to vector<16x8xf32>
    %cst_42 = arith.constant dense<0.000000e+00> : vector<16x16xf32>
    %99 = tpu.matmul %96, %97, %cst_42 {dimension_numbers = #tpu.dot_dimension_numbers<[1], [1], [0], [0], [0, 0, 1, 0], [], []>} : vector<16x8xf32>, vector<16x8xf32>, vector<16x16xf32> -> vector<16x16xf32>
    %100 = arith.addf %99, %49 : vector<16x16xf32>
    %cst_43 = arith.constant dense<0xFF800000> : vector<16xf32>
    %101 = vector.multi_reduction <maximumf>, %100, %cst_43 [1] : vector<16x16xf32> to vector<16xf32>
    %102 = vector.shape_cast %101 : vector<16xf32> to vector<16x1xf32>
    %103 = vector.broadcast %102 : vector<16x1xf32> to vector<16x16xf32>
    %104 = arith.subf %100, %103 : vector<16x16xf32>
    %105 = math.exp %104 : vector<16x16xf32>
    %cst_44 = arith.constant dense<0.000000e+00> : vector<16xf32>
    %106 = vector.multi_reduction <add>, %105, %cst_44 [1] : vector<16x16xf32> to vector<16xf32>
    %107 = vector.shape_cast %106 : vector<16xf32> to vector<16x1xf32>
    %108 = tpu.reciprocal %107 {approx = true} : vector<16x1xf32> -> vector<16x1xf32>
    %109 = vector.broadcast %108 : vector<16x1xf32> to vector<16x16xf32>
    %110 = arith.mulf %105, %109 : vector<16x16xf32>
    %cst_45 = arith.constant dense<0.000000e+00> : vector<16x8xf32>
    %111 = tpu.matmul %110, %98, %cst_45 {dimension_numbers = #tpu.dot_dimension_numbers<[1], [0], [0], [1], [0, 0, 1, 1], [], []>} : vector<16x16xf32>, vector<16x8xf32>, vector<16x8xf32> -> vector<16x8xf32>
    %112 = vector.extract_strided_slice %58 {offsets = [16, 0], sizes = [8, 32], strides = [1, 1]} : vector<32x32xf32> to vector<8x32xf32>
    %cst_46 = arith.constant dense<0.000000e+00> : vector<16x32xf32>
    %113 = tpu.matmul %111, %112, %cst_46 {dimension_numbers = #tpu.dot_dimension_numbers<[1], [0], [0], [1], [0, 0, 1, 1], [], []>} : vector<16x8xf32>, vector<8x32xf32>, vector<16x32xf32> -> vector<16x32xf32>
    %114 = arith.addf %95, %113 : vector<16x32xf32>
    %115 = vector.extract_strided_slice %56 {offsets = [0, 24], sizes = [16, 8], strides = [1, 1]} : vector<16x96xf32> to vector<16x8xf32>
    %116 = vector.extract_strided_slice %56 {offsets = [0, 56], sizes = [16, 8], strides = [1, 1]} : vector<16x96xf32> to vector<16x8xf32>
    %117 = vector.extract_strided_slice %56 {offsets = [0, 88], sizes = [16, 8], strides = [1, 1]} : vector<16x96xf32> to vector<16x8xf32>
    %cst_47 = arith.constant dense<0.000000e+00> : vector<16x16xf32>
    %118 = tpu.matmul %115, %116, %cst_47 {dimension_numbers = #tpu.dot_dimension_numbers<[1], [1], [0], [0], [0, 0, 1, 0], [], []>} : vector<16x8xf32>, vector<16x8xf32>, vector<16x16xf32> -> vector<16x16xf32>
    %119 = arith.addf %118, %49 : vector<16x16xf32>
    %cst_48 = arith.constant dense<0xFF800000> : vector<16xf32>
    %120 = vector.multi_reduction <maximumf>, %119, %cst_48 [1] : vector<16x16xf32> to vector<16xf32>
    %121 = vector.shape_cast %120 : vector<16xf32> to vector<16x1xf32>
    %122 = vector.broadcast %121 : vector<16x1xf32> to vector<16x16xf32>
    %123 = arith.subf %119, %122 : vector<16x16xf32>
    %124 = math.exp %123 : vector<16x16xf32>
    %cst_49 = arith.constant dense<0.000000e+00> : vector<16xf32>
    %125 = vector.multi_reduction <add>, %124, %cst_49 [1] : vector<16x16xf32> to vector<16xf32>
    %126 = vector.shape_cast %125 : vector<16xf32> to vector<16x1xf32>
    %127 = tpu.reciprocal %126 {approx = true} : vector<16x1xf32> -> vector<16x1xf32>
    %128 = vector.broadcast %127 : vector<16x1xf32> to vector<16x16xf32>
    %129 = arith.mulf %124, %128 : vector<16x16xf32>
    %cst_50 = arith.constant dense<0.000000e+00> : vector<16x8xf32>
    %130 = tpu.matmul %129, %117, %cst_50 {dimension_numbers = #tpu.dot_dimension_numbers<[1], [0], [0], [1], [0, 0, 1, 1], [], []>} : vector<16x16xf32>, vector<16x8xf32>, vector<16x8xf32> -> vector<16x8xf32>
    %131 = vector.extract_strided_slice %58 {offsets = [24, 0], sizes = [8, 32], strides = [1, 1]} : vector<32x32xf32> to vector<8x32xf32>
    %cst_51 = arith.constant dense<0.000000e+00> : vector<16x32xf32>
    %132 = tpu.matmul %130, %131, %cst_51 {dimension_numbers = #tpu.dot_dimension_numbers<[1], [0], [0], [1], [0, 0, 1, 1], [], []>} : vector<16x8xf32>, vector<8x32xf32>, vector<16x32xf32> -> vector<16x32xf32>
    %133 = arith.addf %114, %132 : vector<16x32xf32>
    %c0_52 = arith.constant 0 : index
    %c0_53 = arith.constant 0 : index
    %c0_54 = arith.constant 0 : index
    %134 = vector.load %arg7[%c0_52, %c0_53, %c0_54] : memref<2x1x32xf32, #tpu.memory_space<vmem>>, vector<1x1x32xf32>
    %135 = vector.shape_cast %134 : vector<1x1x32xf32> to vector<1x32xf32>
    %136 = vector.broadcast %135 : vector<1x32xf32> to vector<16x32xf32>
    %137 = arith.addf %133, %136 : vector<16x32xf32>
    %138 = arith.addf %48, %137 : vector<16x32xf32>
    %c0_55 = arith.constant 0 : index
    %c0_56 = arith.constant 0 : index
    %c0_57 = arith.constant 0 : index
    %139 = vector.load %arg12[%c0_55, %c0_56, %c0_57] : memref<2x1x32xf32, #tpu.memory_space<vmem>>, vector<1x1x32xf32>
    %140 = vector.shape_cast %139 : vector<1x1x32xf32> to vector<1x32xf32>
    %c0_58 = arith.constant 0 : index
    %c0_59 = arith.constant 0 : index
    %c0_60 = arith.constant 0 : index
    %141 = vector.load %arg13[%c0_58, %c0_59, %c0_60] : memref<2x1x32xf32, #tpu.memory_space<vmem>>, vector<1x1x32xf32>
    %142 = vector.shape_cast %141 : vector<1x1x32xf32> to vector<1x32xf32>
    %cst_61 = arith.constant dense<0.000000e+00> : vector<16xf32>
    %143 = vector.multi_reduction <add>, %138, %cst_61 [1] : vector<16x32xf32> to vector<16xf32>
    %144 = vector.shape_cast %143 : vector<16xf32> to vector<16x1xf32>
    %cst_62 = arith.constant 3.200000e+01 : f32
    %145 = vector.broadcast %cst_62 : f32 to vector<16x1xf32>
    %146 = arith.divf %144, %145 : vector<16x1xf32>
    %147 = vector.broadcast %146 : vector<16x1xf32> to vector<16x32xf32>
    %148 = arith.subf %138, %147 : vector<16x32xf32>
    %149 = arith.mulf %148, %148 : vector<16x32xf32>
    %cst_63 = arith.constant dense<0.000000e+00> : vector<16xf32>
    %150 = vector.multi_reduction <add>, %149, %cst_63 [1] : vector<16x32xf32> to vector<16xf32>
    %151 = vector.shape_cast %150 : vector<16xf32> to vector<16x1xf32>
    %cst_64 = arith.constant 3.200000e+01 : f32
    %152 = vector.broadcast %cst_64 : f32 to vector<16x1xf32>
    %153 = arith.divf %151, %152 : vector<16x1xf32>
    %cst_65 = arith.constant 9.99999974E-6 : f32
    %154 = vector.broadcast %cst_65 : f32 to vector<16x1xf32>
    %155 = arith.addf %153, %154 : vector<16x1xf32>
    %156 = math.rsqrt %155 : vector<16x1xf32>
    %157 = vector.broadcast %156 : vector<16x1xf32> to vector<16x32xf32>
    %158 = arith.mulf %148, %157 : vector<16x32xf32>
    %159 = vector.broadcast %140 : vector<1x32xf32> to vector<16x32xf32>
    %160 = arith.mulf %158, %159 : vector<16x32xf32>
    %161 = vector.broadcast %142 : vector<1x32xf32> to vector<16x32xf32>
    %162 = arith.addf %160, %161 : vector<16x32xf32>
    %c0_66 = arith.constant 0 : index
    %c0_67 = arith.constant 0 : index
    %c0_68 = arith.constant 0 : index
    %163 = vector.load %arg8[%c0_66, %c0_67, %c0_68] : memref<2x32x64xf32, #tpu.memory_space<vmem>>, vector<1x32x64xf32>
    %164 = vector.shape_cast %163 : vector<1x32x64xf32> to vector<32x64xf32>
    %cst_69 = arith.constant dense<0.000000e+00> : vector<16x64xf32>
    %165 = tpu.matmul %162, %164, %cst_69 {dimension_numbers = #tpu.dot_dimension_numbers<[1], [0], [0], [1], [0, 0, 1, 1], [], []>} : vector<16x32xf32>, vector<32x64xf32>, vector<16x64xf32> -> vector<16x64xf32>
    %c0_70 = arith.constant 0 : index
    %c0_71 = arith.constant 0 : index
    %c0_72 = arith.constant 0 : index
    %166 = vector.load %arg9[%c0_70, %c0_71, %c0_72] : memref<2x1x64xf32, #tpu.memory_space<vmem>>, vector<1x1x64xf32>
    %167 = vector.shape_cast %166 : vector<1x1x64xf32> to vector<1x64xf32>
    %168 = vector.broadcast %167 : vector<1x64xf32> to vector<16x64xf32>
    %169 = arith.addf %165, %168 : vector<16x64xf32>
    %cst_73 = arith.constant 0.000000e+00 : f32
    %170 = vector.broadcast %cst_73 : f32 to vector<16x64xf32>
    %171 = arith.maximumf %169, %170 : vector<16x64xf32>
    %c0_74 = arith.constant 0 : index
    %c0_75 = arith.constant 0 : index
    %c0_76 = arith.constant 0 : index
    %172 = vector.load %arg10[%c0_74, %c0_75, %c0_76] : memref<2x64x32xf32, #tpu.memory_space<vmem>>, vector<1x64x32xf32>
    %173 = vector.shape_cast %172 : vector<1x64x32xf32> to vector<64x32xf32>
    %cst_77 = arith.constant dense<0.000000e+00> : vector<16x32xf32>
    %174 = tpu.matmul %171, %173, %cst_77 {dimension_numbers = #tpu.dot_dimension_numbers<[1], [0], [0], [1], [0, 0, 1, 1], [], []>} : vector<16x64xf32>, vector<64x32xf32>, vector<16x32xf32> -> vector<16x32xf32>
    %c0_78 = arith.constant 0 : index
    %c0_79 = arith.constant 0 : index
    %c0_80 = arith.constant 0 : index
    %175 = vector.load %arg11[%c0_78, %c0_79, %c0_80] : memref<2x1x32xf32, #tpu.memory_space<vmem>>, vector<1x1x32xf32>
    %176 = vector.shape_cast %175 : vector<1x1x32xf32> to vector<1x32xf32>
    %177 = vector.broadcast %176 : vector<1x32xf32> to vector<16x32xf32>
    %178 = arith.addf %174, %177 : vector<16x32xf32>
    %179 = arith.addf %162, %178 : vector<16x32xf32>
    %c0_81 = arith.constant 0 : index
    %c0_82 = arith.constant 0 : index
    %c0_83 = arith.constant 0 : index
    %180 = vector.load %arg14[%c0_81, %c0_82, %c0_83] : memref<2x1x32xf32, #tpu.memory_space<vmem>>, vector<1x1x32xf32>
    %181 = vector.shape_cast %180 : vector<1x1x32xf32> to vector<1x32xf32>
    %c0_84 = arith.constant 0 : index
    %c0_85 = arith.constant 0 : index
    %c0_86 = arith.constant 0 : index
    %182 = vector.load %arg15[%c0_84, %c0_85, %c0_86] : memref<2x1x32xf32, #tpu.memory_space<vmem>>, vector<1x1x32xf32>
    %183 = vector.shape_cast %182 : vector<1x1x32xf32> to vector<1x32xf32>
    %cst_87 = arith.constant dense<0.000000e+00> : vector<16xf32>
    %184 = vector.multi_reduction <add>, %179, %cst_87 [1] : vector<16x32xf32> to vector<16xf32>
    %185 = vector.shape_cast %184 : vector<16xf32> to vector<16x1xf32>
    %cst_88 = arith.constant 3.200000e+01 : f32
    %186 = vector.broadcast %cst_88 : f32 to vector<16x1xf32>
    %187 = arith.divf %185, %186 : vector<16x1xf32>
    %188 = vector.broadcast %187 : vector<16x1xf32> to vector<16x32xf32>
    %189 = arith.subf %179, %188 : vector<16x32xf32>
    %190 = arith.mulf %189, %189 : vector<16x32xf32>
    %cst_89 = arith.constant dense<0.000000e+00> : vector<16xf32>
    %191 = vector.multi_reduction <add>, %190, %cst_89 [1] : vector<16x32xf32> to vector<16xf32>
    %192 = vector.shape_cast %191 : vector<16xf32> to vector<16x1xf32>
    %cst_90 = arith.constant 3.200000e+01 : f32
    %193 = vector.broadcast %cst_90 : f32 to vector<16x1xf32>
    %194 = arith.divf %192, %193 : vector<16x1xf32>
    %cst_91 = arith.constant 9.99999974E-6 : f32
    %195 = vector.broadcast %cst_91 : f32 to vector<16x1xf32>
    %196 = arith.addf %194, %195 : vector<16x1xf32>
    %197 = math.rsqrt %196 : vector<16x1xf32>
    %198 = vector.broadcast %197 : vector<16x1xf32> to vector<16x32xf32>
    %199 = arith.mulf %189, %198 : vector<16x32xf32>
    %200 = vector.broadcast %181 : vector<1x32xf32> to vector<16x32xf32>
    %201 = arith.mulf %199, %200 : vector<16x32xf32>
    %202 = vector.broadcast %183 : vector<1x32xf32> to vector<16x32xf32>
    %203 = arith.addf %201, %202 : vector<16x32xf32>
    %c1_92 = arith.constant 1 : index
    %c0_93 = arith.constant 0 : index
    %c0_94 = arith.constant 0 : index
    %204 = vector.load %arg4[%c1_92, %c0_93, %c0_94] : memref<2x32x96xf32, #tpu.memory_space<vmem>>, vector<1x32x96xf32>
    %205 = vector.shape_cast %204 : vector<1x32x96xf32> to vector<32x96xf32>
    %cst_95 = arith.constant dense<0.000000e+00> : vector<16x96xf32>
    %206 = tpu.matmul %203, %205, %cst_95 {dimension_numbers = #tpu.dot_dimension_numbers<[1], [0], [0], [1], [0, 0, 1, 1], [], []>} : vector<16x32xf32>, vector<32x96xf32>, vector<16x96xf32> -> vector<16x96xf32>
    %c1_96 = arith.constant 1 : index
    %c0_97 = arith.constant 0 : index
    %c0_98 = arith.constant 0 : index
    %207 = vector.load %arg5[%c1_96, %c0_97, %c0_98] : memref<2x1x96xf32, #tpu.memory_space<vmem>>, vector<1x1x96xf32>
    %208 = vector.shape_cast %207 : vector<1x1x96xf32> to vector<1x96xf32>
    %209 = vector.broadcast %208 : vector<1x96xf32> to vector<16x96xf32>
    %210 = arith.addf %206, %209 : vector<16x96xf32>
    %c1_99 = arith.constant 1 : index
    %c0_100 = arith.constant 0 : index
    %c0_101 = arith.constant 0 : index
    %211 = vector.load %arg6[%c1_99, %c0_100, %c0_101] : memref<2x32x32xf32, #tpu.memory_space<vmem>>, vector<1x32x32xf32>
    %212 = vector.shape_cast %211 : vector<1x32x32xf32> to vector<32x32xf32>
    %213 = vector.extract_strided_slice %210 {offsets = [0, 0], sizes = [16, 8], strides = [1, 1]} : vector<16x96xf32> to vector<16x8xf32>
    %214 = vector.extract_strided_slice %210 {offsets = [0, 32], sizes = [16, 8], strides = [1, 1]} : vector<16x96xf32> to vector<16x8xf32>
    %215 = vector.extract_strided_slice %210 {offsets = [0, 64], sizes = [16, 8], strides = [1, 1]} : vector<16x96xf32> to vector<16x8xf32>
    %cst_102 = arith.constant dense<0.000000e+00> : vector<16x16xf32>
    %216 = tpu.matmul %213, %214, %cst_102 {dimension_numbers = #tpu.dot_dimension_numbers<[1], [1], [0], [0], [0, 0, 1, 0], [], []>} : vector<16x8xf32>, vector<16x8xf32>, vector<16x16xf32> -> vector<16x16xf32>
    %217 = arith.addf %216, %49 : vector<16x16xf32>
    %cst_103 = arith.constant dense<0xFF800000> : vector<16xf32>
    %218 = vector.multi_reduction <maximumf>, %217, %cst_103 [1] : vector<16x16xf32> to vector<16xf32>
    %219 = vector.shape_cast %218 : vector<16xf32> to vector<16x1xf32>
    %220 = vector.broadcast %219 : vector<16x1xf32> to vector<16x16xf32>
    %221 = arith.subf %217, %220 : vector<16x16xf32>
    %222 = math.exp %221 : vector<16x16xf32>
    %cst_104 = arith.constant dense<0.000000e+00> : vector<16xf32>
    %223 = vector.multi_reduction <add>, %222, %cst_104 [1] : vector<16x16xf32> to vector<16xf32>
    %224 = vector.shape_cast %223 : vector<16xf32> to vector<16x1xf32>
    %225 = tpu.reciprocal %224 {approx = true} : vector<16x1xf32> -> vector<16x1xf32>
    %226 = vector.broadcast %225 : vector<16x1xf32> to vector<16x16xf32>
    %227 = arith.mulf %222, %226 : vector<16x16xf32>
    %cst_105 = arith.constant dense<0.000000e+00> : vector<16x8xf32>
    %228 = tpu.matmul %227, %215, %cst_105 {dimension_numbers = #tpu.dot_dimension_numbers<[1], [0], [0], [1], [0, 0, 1, 1], [], []>} : vector<16x16xf32>, vector<16x8xf32>, vector<16x8xf32> -> vector<16x8xf32>
    %229 = vector.extract_strided_slice %212 {offsets = [0, 0], sizes = [8, 32], strides = [1, 1]} : vector<32x32xf32> to vector<8x32xf32>
    %cst_106 = arith.constant dense<0.000000e+00> : vector<16x32xf32>
    %230 = tpu.matmul %228, %229, %cst_106 {dimension_numbers = #tpu.dot_dimension_numbers<[1], [0], [0], [1], [0, 0, 1, 1], [], []>} : vector<16x8xf32>, vector<8x32xf32>, vector<16x32xf32> -> vector<16x32xf32>
    %231 = vector.extract_strided_slice %210 {offsets = [0, 8], sizes = [16, 8], strides = [1, 1]} : vector<16x96xf32> to vector<16x8xf32>
    %232 = vector.extract_strided_slice %210 {offsets = [0, 40], sizes = [16, 8], strides = [1, 1]} : vector<16x96xf32> to vector<16x8xf32>
    %233 = vector.extract_strided_slice %210 {offsets = [0, 72], sizes = [16, 8], strides = [1, 1]} : vector<16x96xf32> to vector<16x8xf32>
    %cst_107 = arith.constant dense<0.000000e+00> : vector<16x16xf32>
    %234 = tpu.matmul %231, %232, %cst_107 {dimension_numbers = #tpu.dot_dimension_numbers<[1], [1], [0], [0], [0, 0, 1, 0], [], []>} : vector<16x8xf32>, vector<16x8xf32>, vector<16x16xf32> -> vector<16x16xf32>
    %235 = arith.addf %234, %49 : vector<16x16xf32>
    %cst_108 = arith.constant dense<0xFF800000> : vector<16xf32>
    %236 = vector.multi_reduction <maximumf>, %235, %cst_108 [1] : vector<16x16xf32> to vector<16xf32>
    %237 = vector.shape_cast %236 : vector<16xf32> to vector<16x1xf32>
    %238 = vector.broadcast %237 : vector<16x1xf32> to vector<16x16xf32>
    %239 = arith.subf %235, %238 : vector<16x16xf32>
    %240 = math.exp %239 : vector<16x16xf32>
    %cst_109 = arith.constant dense<0.000000e+00> : vector<16xf32>
    %241 = vector.multi_reduction <add>, %240, %cst_109 [1] : vector<16x16xf32> to vector<16xf32>
    %242 = vector.shape_cast %241 : vector<16xf32> to vector<16x1xf32>
    %243 = tpu.reciprocal %242 {approx = true} : vector<16x1xf32> -> vector<16x1xf32>
    %244 = vector.broadcast %243 : vector<16x1xf32> to vector<16x16xf32>
    %245 = arith.mulf %240, %244 : vector<16x16xf32>
    %cst_110 = arith.constant dense<0.000000e+00> : vector<16x8xf32>
    %246 = tpu.matmul %245, %233, %cst_110 {dimension_numbers = #tpu.dot_dimension_numbers<[1], [0], [0], [1], [0, 0, 1, 1], [], []>} : vector<16x16xf32>, vector<16x8xf32>, vector<16x8xf32> -> vector<16x8xf32>
    %247 = vector.extract_strided_slice %212 {offsets = [8, 0], sizes = [8, 32], strides = [1, 1]} : vector<32x32xf32> to vector<8x32xf32>
    %cst_111 = arith.constant dense<0.000000e+00> : vector<16x32xf32>
    %248 = tpu.matmul %246, %247, %cst_111 {dimension_numbers = #tpu.dot_dimension_numbers<[1], [0], [0], [1], [0, 0, 1, 1], [], []>} : vector<16x8xf32>, vector<8x32xf32>, vector<16x32xf32> -> vector<16x32xf32>
    %249 = arith.addf %230, %248 : vector<16x32xf32>
    %250 = vector.extract_strided_slice %210 {offsets = [0, 16], sizes = [16, 8], strides = [1, 1]} : vector<16x96xf32> to vector<16x8xf32>
    %251 = vector.extract_strided_slice %210 {offsets = [0, 48], sizes = [16, 8], strides = [1, 1]} : vector<16x96xf32> to vector<16x8xf32>
    %252 = vector.extract_strided_slice %210 {offsets = [0, 80], sizes = [16, 8], strides = [1, 1]} : vector<16x96xf32> to vector<16x8xf32>
    %cst_112 = arith.constant dense<0.000000e+00> : vector<16x16xf32>
    %253 = tpu.matmul %250, %251, %cst_112 {dimension_numbers = #tpu.dot_dimension_numbers<[1], [1], [0], [0], [0, 0, 1, 0], [], []>} : vector<16x8xf32>, vector<16x8xf32>, vector<16x16xf32> -> vector<16x16xf32>
    %254 = arith.addf %253, %49 : vector<16x16xf32>
    %cst_113 = arith.constant dense<0xFF800000> : vector<16xf32>
    %255 = vector.multi_reduction <maximumf>, %254, %cst_113 [1] : vector<16x16xf32> to vector<16xf32>
    %256 = vector.shape_cast %255 : vector<16xf32> to vector<16x1xf32>
    %257 = vector.broadcast %256 : vector<16x1xf32> to vector<16x16xf32>
    %258 = arith.subf %254, %257 : vector<16x16xf32>
    %259 = math.exp %258 : vector<16x16xf32>
    %cst_114 = arith.constant dense<0.000000e+00> : vector<16xf32>
    %260 = vector.multi_reduction <add>, %259, %cst_114 [1] : vector<16x16xf32> to vector<16xf32>
    %261 = vector.shape_cast %260 : vector<16xf32> to vector<16x1xf32>
    %262 = tpu.reciprocal %261 {approx = true} : vector<16x1xf32> -> vector<16x1xf32>
    %263 = vector.broadcast %262 : vector<16x1xf32> to vector<16x16xf32>
    %264 = arith.mulf %259, %263 : vector<16x16xf32>
    %cst_115 = arith.constant dense<0.000000e+00> : vector<16x8xf32>
    %265 = tpu.matmul %264, %252, %cst_115 {dimension_numbers = #tpu.dot_dimension_numbers<[1], [0], [0], [1], [0, 0, 1, 1], [], []>} : vector<16x16xf32>, vector<16x8xf32>, vector<16x8xf32> -> vector<16x8xf32>
    %266 = vector.extract_strided_slice %212 {offsets = [16, 0], sizes = [8, 32], strides = [1, 1]} : vector<32x32xf32> to vector<8x32xf32>
    %cst_116 = arith.constant dense<0.000000e+00> : vector<16x32xf32>
    %267 = tpu.matmul %265, %266, %cst_116 {dimension_numbers = #tpu.dot_dimension_numbers<[1], [0], [0], [1], [0, 0, 1, 1], [], []>} : vector<16x8xf32>, vector<8x32xf32>, vector<16x32xf32> -> vector<16x32xf32>
    %268 = arith.addf %249, %267 : vector<16x32xf32>
    %269 = vector.extract_strided_slice %210 {offsets = [0, 24], sizes = [16, 8], strides = [1, 1]} : vector<16x96xf32> to vector<16x8xf32>
    %270 = vector.extract_strided_slice %210 {offsets = [0, 56], sizes = [16, 8], strides = [1, 1]} : vector<16x96xf32> to vector<16x8xf32>
    %271 = vector.extract_strided_slice %210 {offsets = [0, 88], sizes = [16, 8], strides = [1, 1]} : vector<16x96xf32> to vector<16x8xf32>
    %cst_117 = arith.constant dense<0.000000e+00> : vector<16x16xf32>
    %272 = tpu.matmul %269, %270, %cst_117 {dimension_numbers = #tpu.dot_dimension_numbers<[1], [1], [0], [0], [0, 0, 1, 0], [], []>} : vector<16x8xf32>, vector<16x8xf32>, vector<16x16xf32> -> vector<16x16xf32>
    %273 = arith.addf %272, %49 : vector<16x16xf32>
    %cst_118 = arith.constant dense<0xFF800000> : vector<16xf32>
    %274 = vector.multi_reduction <maximumf>, %273, %cst_118 [1] : vector<16x16xf32> to vector<16xf32>
    %275 = vector.shape_cast %274 : vector<16xf32> to vector<16x1xf32>
    %276 = vector.broadcast %275 : vector<16x1xf32> to vector<16x16xf32>
    %277 = arith.subf %273, %276 : vector<16x16xf32>
    %278 = math.exp %277 : vector<16x16xf32>
    %cst_119 = arith.constant dense<0.000000e+00> : vector<16xf32>
    %279 = vector.multi_reduction <add>, %278, %cst_119 [1] : vector<16x16xf32> to vector<16xf32>
    %280 = vector.shape_cast %279 : vector<16xf32> to vector<16x1xf32>
    %281 = tpu.reciprocal %280 {approx = true} : vector<16x1xf32> -> vector<16x1xf32>
    %282 = vector.broadcast %281 : vector<16x1xf32> to vector<16x16xf32>
    %283 = arith.mulf %278, %282 : vector<16x16xf32>
    %cst_120 = arith.constant dense<0.000000e+00> : vector<16x8xf32>
    %284 = tpu.matmul %283, %271, %cst_120 {dimension_numbers = #tpu.dot_dimension_numbers<[1], [0], [0], [1], [0, 0, 1, 1], [], []>} : vector<16x16xf32>, vector<16x8xf32>, vector<16x8xf32> -> vector<16x8xf32>
    %285 = vector.extract_strided_slice %212 {offsets = [24, 0], sizes = [8, 32], strides = [1, 1]} : vector<32x32xf32> to vector<8x32xf32>
    %cst_121 = arith.constant dense<0.000000e+00> : vector<16x32xf32>
    %286 = tpu.matmul %284, %285, %cst_121 {dimension_numbers = #tpu.dot_dimension_numbers<[1], [0], [0], [1], [0, 0, 1, 1], [], []>} : vector<16x8xf32>, vector<8x32xf32>, vector<16x32xf32> -> vector<16x32xf32>
    %287 = arith.addf %268, %286 : vector<16x32xf32>
    %c1_122 = arith.constant 1 : index
    %c0_123 = arith.constant 0 : index
    %c0_124 = arith.constant 0 : index
    %288 = vector.load %arg7[%c1_122, %c0_123, %c0_124] : memref<2x1x32xf32, #tpu.memory_space<vmem>>, vector<1x1x32xf32>
    %289 = vector.shape_cast %288 : vector<1x1x32xf32> to vector<1x32xf32>
    %290 = vector.broadcast %289 : vector<1x32xf32> to vector<16x32xf32>
    %291 = arith.addf %287, %290 : vector<16x32xf32>
    %292 = arith.addf %203, %291 : vector<16x32xf32>
    %c1_125 = arith.constant 1 : index
    %c0_126 = arith.constant 0 : index
    %c0_127 = arith.constant 0 : index
    %293 = vector.load %arg12[%c1_125, %c0_126, %c0_127] : memref<2x1x32xf32, #tpu.memory_space<vmem>>, vector<1x1x32xf32>
    %294 = vector.shape_cast %293 : vector<1x1x32xf32> to vector<1x32xf32>
    %c1_128 = arith.constant 1 : index
    %c0_129 = arith.constant 0 : index
    %c0_130 = arith.constant 0 : index
    %295 = vector.load %arg13[%c1_128, %c0_129, %c0_130] : memref<2x1x32xf32, #tpu.memory_space<vmem>>, vector<1x1x32xf32>
    %296 = vector.shape_cast %295 : vector<1x1x32xf32> to vector<1x32xf32>
    %cst_131 = arith.constant dense<0.000000e+00> : vector<16xf32>
    %297 = vector.multi_reduction <add>, %292, %cst_131 [1] : vector<16x32xf32> to vector<16xf32>
    %298 = vector.shape_cast %297 : vector<16xf32> to vector<16x1xf32>
    %cst_132 = arith.constant 3.200000e+01 : f32
    %299 = vector.broadcast %cst_132 : f32 to vector<16x1xf32>
    %300 = arith.divf %298, %299 : vector<16x1xf32>
    %301 = vector.broadcast %300 : vector<16x1xf32> to vector<16x32xf32>
    %302 = arith.subf %292, %301 : vector<16x32xf32>
    %303 = arith.mulf %302, %302 : vector<16x32xf32>
    %cst_133 = arith.constant dense<0.000000e+00> : vector<16xf32>
    %304 = vector.multi_reduction <add>, %303, %cst_133 [1] : vector<16x32xf32> to vector<16xf32>
    %305 = vector.shape_cast %304 : vector<16xf32> to vector<16x1xf32>
    %cst_134 = arith.constant 3.200000e+01 : f32
    %306 = vector.broadcast %cst_134 : f32 to vector<16x1xf32>
    %307 = arith.divf %305, %306 : vector<16x1xf32>
    %cst_135 = arith.constant 9.99999974E-6 : f32
    %308 = vector.broadcast %cst_135 : f32 to vector<16x1xf32>
    %309 = arith.addf %307, %308 : vector<16x1xf32>
    %310 = math.rsqrt %309 : vector<16x1xf32>
    %311 = vector.broadcast %310 : vector<16x1xf32> to vector<16x32xf32>
    %312 = arith.mulf %302, %311 : vector<16x32xf32>
    %313 = vector.broadcast %294 : vector<1x32xf32> to vector<16x32xf32>
    %314 = arith.mulf %312, %313 : vector<16x32xf32>
    %315 = vector.broadcast %296 : vector<1x32xf32> to vector<16x32xf32>
    %316 = arith.addf %314, %315 : vector<16x32xf32>
    %c1_136 = arith.constant 1 : index
    %c0_137 = arith.constant 0 : index
    %c0_138 = arith.constant 0 : index
    %317 = vector.load %arg8[%c1_136, %c0_137, %c0_138] : memref<2x32x64xf32, #tpu.memory_space<vmem>>, vector<1x32x64xf32>
    %318 = vector.shape_cast %317 : vector<1x32x64xf32> to vector<32x64xf32>
    %cst_139 = arith.constant dense<0.000000e+00> : vector<16x64xf32>
    %319 = tpu.matmul %316, %318, %cst_139 {dimension_numbers = #tpu.dot_dimension_numbers<[1], [0], [0], [1], [0, 0, 1, 1], [], []>} : vector<16x32xf32>, vector<32x64xf32>, vector<16x64xf32> -> vector<16x64xf32>
    %c1_140 = arith.constant 1 : index
    %c0_141 = arith.constant 0 : index
    %c0_142 = arith.constant 0 : index
    %320 = vector.load %arg9[%c1_140, %c0_141, %c0_142] : memref<2x1x64xf32, #tpu.memory_space<vmem>>, vector<1x1x64xf32>
    %321 = vector.shape_cast %320 : vector<1x1x64xf32> to vector<1x64xf32>
    %322 = vector.broadcast %321 : vector<1x64xf32> to vector<16x64xf32>
    %323 = arith.addf %319, %322 : vector<16x64xf32>
    %cst_143 = arith.constant 0.000000e+00 : f32
    %324 = vector.broadcast %cst_143 : f32 to vector<16x64xf32>
    %325 = arith.maximumf %323, %324 : vector<16x64xf32>
    %c1_144 = arith.constant 1 : index
    %c0_145 = arith.constant 0 : index
    %c0_146 = arith.constant 0 : index
    %326 = vector.load %arg10[%c1_144, %c0_145, %c0_146] : memref<2x64x32xf32, #tpu.memory_space<vmem>>, vector<1x64x32xf32>
    %327 = vector.shape_cast %326 : vector<1x64x32xf32> to vector<64x32xf32>
    %cst_147 = arith.constant dense<0.000000e+00> : vector<16x32xf32>
    %328 = tpu.matmul %325, %327, %cst_147 {dimension_numbers = #tpu.dot_dimension_numbers<[1], [0], [0], [1], [0, 0, 1, 1], [], []>} : vector<16x64xf32>, vector<64x32xf32>, vector<16x32xf32> -> vector<16x32xf32>
    %c1_148 = arith.constant 1 : index
    %c0_149 = arith.constant 0 : index
    %c0_150 = arith.constant 0 : index
    %329 = vector.load %arg11[%c1_148, %c0_149, %c0_150] : memref<2x1x32xf32, #tpu.memory_space<vmem>>, vector<1x1x32xf32>
    %330 = vector.shape_cast %329 : vector<1x1x32xf32> to vector<1x32xf32>
    %331 = vector.broadcast %330 : vector<1x32xf32> to vector<16x32xf32>
    %332 = arith.addf %328, %331 : vector<16x32xf32>
    %333 = arith.addf %316, %332 : vector<16x32xf32>
    %c1_151 = arith.constant 1 : index
    %c0_152 = arith.constant 0 : index
    %c0_153 = arith.constant 0 : index
    %334 = vector.load %arg14[%c1_151, %c0_152, %c0_153] : memref<2x1x32xf32, #tpu.memory_space<vmem>>, vector<1x1x32xf32>
    %335 = vector.shape_cast %334 : vector<1x1x32xf32> to vector<1x32xf32>
    %c1_154 = arith.constant 1 : index
    %c0_155 = arith.constant 0 : index
    %c0_156 = arith.constant 0 : index
    %336 = vector.load %arg15[%c1_154, %c0_155, %c0_156] : memref<2x1x32xf32, #tpu.memory_space<vmem>>, vector<1x1x32xf32>
    %337 = vector.shape_cast %336 : vector<1x1x32xf32> to vector<1x32xf32>
    %cst_157 = arith.constant dense<0.000000e+00> : vector<16xf32>
    %338 = vector.multi_reduction <add>, %333, %cst_157 [1] : vector<16x32xf32> to vector<16xf32>
    %339 = vector.shape_cast %338 : vector<16xf32> to vector<16x1xf32>
    %cst_158 = arith.constant 3.200000e+01 : f32
    %340 = vector.broadcast %cst_158 : f32 to vector<16x1xf32>
    %341 = arith.divf %339, %340 : vector<16x1xf32>
    %342 = vector.broadcast %341 : vector<16x1xf32> to vector<16x32xf32>
    %343 = arith.subf %333, %342 : vector<16x32xf32>
    %344 = arith.mulf %343, %343 : vector<16x32xf32>
    %cst_159 = arith.constant dense<0.000000e+00> : vector<16xf32>
    %345 = vector.multi_reduction <add>, %344, %cst_159 [1] : vector<16x32xf32> to vector<16xf32>
    %346 = vector.shape_cast %345 : vector<16xf32> to vector<16x1xf32>
    %cst_160 = arith.constant 3.200000e+01 : f32
    %347 = vector.broadcast %cst_160 : f32 to vector<16x1xf32>
    %348 = arith.divf %346, %347 : vector<16x1xf32>
    %cst_161 = arith.constant 9.99999974E-6 : f32
    %349 = vector.broadcast %cst_161 : f32 to vector<16x1xf32>
    %350 = arith.addf %348, %349 : vector<16x1xf32>
    %351 = math.rsqrt %350 : vector<16x1xf32>
    %352 = vector.broadcast %351 : vector<16x1xf32> to vector<16x32xf32>
    %353 = arith.mulf %343, %352 : vector<16x32xf32>
    %354 = vector.broadcast %335 : vector<1x32xf32> to vector<16x32xf32>
    %355 = arith.mulf %353, %354 : vector<16x32xf32>
    %356 = vector.broadcast %337 : vector<1x32xf32> to vector<16x32xf32>
    %357 = arith.addf %355, %356 : vector<16x32xf32>
    %c0_162 = arith.constant 0 : index
    %c0_163 = arith.constant 0 : index
    %358 = vector.load %arg16[%c0_162, %c0_163] : memref<1x32xf32, #tpu.memory_space<vmem>>, vector<1x32xf32>
    %c0_164 = arith.constant 0 : index
    %c0_165 = arith.constant 0 : index
    %359 = vector.load %arg17[%c0_164, %c0_165] : memref<1x32xf32, #tpu.memory_space<vmem>>, vector<1x32xf32>
    %cst_166 = arith.constant dense<0.000000e+00> : vector<16xf32>
    %360 = vector.multi_reduction <add>, %357, %cst_166 [1] : vector<16x32xf32> to vector<16xf32>
    %361 = vector.shape_cast %360 : vector<16xf32> to vector<16x1xf32>
    %cst_167 = arith.constant 3.200000e+01 : f32
    %362 = vector.broadcast %cst_167 : f32 to vector<16x1xf32>
    %363 = arith.divf %361, %362 : vector<16x1xf32>
    %364 = vector.broadcast %363 : vector<16x1xf32> to vector<16x32xf32>
    %365 = arith.subf %357, %364 : vector<16x32xf32>
    %366 = arith.mulf %365, %365 : vector<16x32xf32>
    %cst_168 = arith.constant dense<0.000000e+00> : vector<16xf32>
    %367 = vector.multi_reduction <add>, %366, %cst_168 [1] : vector<16x32xf32> to vector<16xf32>
    %368 = vector.shape_cast %367 : vector<16xf32> to vector<16x1xf32>
    %cst_169 = arith.constant 3.200000e+01 : f32
    %369 = vector.broadcast %cst_169 : f32 to vector<16x1xf32>
    %370 = arith.divf %368, %369 : vector<16x1xf32>
    %cst_170 = arith.constant 9.99999974E-6 : f32
    %371 = vector.broadcast %cst_170 : f32 to vector<16x1xf32>
    %372 = arith.addf %370, %371 : vector<16x1xf32>
    %373 = math.rsqrt %372 : vector<16x1xf32>
    %374 = vector.broadcast %373 : vector<16x1xf32> to vector<16x32xf32>
    %375 = arith.mulf %365, %374 : vector<16x32xf32>
    %376 = vector.broadcast %358 : vector<1x32xf32> to vector<16x32xf32>
    %377 = arith.mulf %375, %376 : vector<16x32xf32>
    %378 = vector.broadcast %359 : vector<1x32xf32> to vector<16x32xf32>
    %379 = arith.addf %377, %378 : vector<16x32xf32>
    %c0_171 = arith.constant 0 : index
    %c0_172 = arith.constant 0 : index
    %380 = vector.load %arg18[%c0_171, %c0_172] : memref<32x4xf32, #tpu.memory_space<vmem>>, vector<32x4xf32>
    %cst_173 = arith.constant dense<0.000000e+00> : vector<16x4xf32>
    %381 = tpu.matmul %379, %380, %cst_173 {dimension_numbers = #tpu.dot_dimension_numbers<[1], [0], [0], [1], [0, 0, 1, 1], [], []>} : vector<16x32xf32>, vector<32x4xf32>, vector<16x4xf32> -> vector<16x4xf32>
    %c0_174 = arith.constant 0 : index
    %c0_175 = arith.constant 0 : index
    %382 = vector.load %arg19[%c0_174, %c0_175] : memref<1x4xf32, #tpu.memory_space<vmem>>, vector<1x4xf32>
    %383 = vector.broadcast %382 : vector<1x4xf32> to vector<16x4xf32>
    %384 = arith.addf %381, %383 : vector<16x4xf32>
    %c0_176 = arith.constant 0 : index
    %c0_177 = arith.constant 0 : index
    %385 = vector.load %arg20[%c0_176, %c0_177] : memref<16x16xf32, #tpu.memory_space<vmem>>, vector<16x16xf32>
    %cst_178 = arith.constant dense<0.000000e+00> : vector<16x4xf32>
    %386 = tpu.matmul %385, %384, %cst_178 {dimension_numbers = #tpu.dot_dimension_numbers<[1], [0], [0], [1], [0, 0, 1, 1], [], []>} : vector<16x16xf32>, vector<16x4xf32>, vector<16x4xf32> -> vector<16x4xf32>
    %c0_179 = arith.constant 0 : index
    %c0_180 = arith.constant 0 : index
    %387 = vector.load %arg21[%c0_179, %c0_180] : memref<16x1xf32, #tpu.memory_space<vmem>>, vector<16x1xf32>
    %388 = vector.broadcast %387 : vector<16x1xf32> to vector<16x4xf32>
    %389 = arith.addf %386, %388 : vector<16x4xf32>
    %390 = vector.extract_strided_slice %389 {offsets = [0, 0], sizes = [8, 4], strides = [1, 1]} : vector<16x4xf32> to vector<8x4xf32>
    %391 = vector.broadcast %15 : vector<1x4xf32> to vector<8x4xf32>
    %392 = arith.mulf %390, %391 : vector<8x4xf32>
    %393 = vector.broadcast %5 : vector<1x4xf32> to vector<8x4xf32>
    %394 = arith.addf %392, %393 : vector<8x4xf32>
    %c0_181 = arith.constant 0 : index
    %c0_182 = arith.constant 0 : index
    %c0_183 = arith.constant 0 : index
    %395 = vector.load %arg22[%c0_181, %c0_182, %c0_183] : memref<2x8x4xf32, #tpu.memory_space<vmem>>, vector<1x8x4xf32>
    %396 = vector.shape_cast %395 : vector<1x8x4xf32> to vector<8x4xf32>
    %397 = vector.shape_cast %394 : vector<8x4xf32> to vector<1x8x4xf32>
    tpu.vector_store %arg22[%c0_181, %c0_182, %c0_183], %397 {strides = array<i32>} : memref<2x8x4xf32, #tpu.memory_space<vmem>>, vector<1x8x4xf32>,
    %398 = vector.extract_strided_slice %389 {offsets = [8, 0], sizes = [8, 4], strides = [1, 1]} : vector<16x4xf32> to vector<8x4xf32>
    %399 = vector.broadcast %37 : vector<1x4xf32> to vector<8x4xf32>
    %400 = arith.mulf %398, %399 : vector<8x4xf32>
    %401 = vector.broadcast %27 : vector<1x4xf32> to vector<8x4xf32>
    %402 = arith.addf %400, %401 : vector<8x4xf32>
    %c1_184 = arith.constant 1 : index
    %c0_185 = arith.constant 0 : index
    %c0_186 = arith.constant 0 : index
    %403 = vector.load %arg22[%c1_184, %c0_185, %c0_186] : memref<2x8x4xf32, #tpu.memory_space<vmem>>, vector<1x8x4xf32>
    %404 = vector.shape_cast %403 : vector<1x8x4xf32> to vector<8x4xf32>
    %405 = vector.shape_cast %402 : vector<8x4xf32> to vector<1x8x4xf32>
    tpu.vector_store %arg22[%c1_184, %c0_185, %c0_186], %405 {strides = array<i32>} : memref<2x8x4xf32, #tpu.memory_space<vmem>>, vector<1x8x4xf32>,
    return
  }
}

</mosaic_0001>

<bundles_post_ra>
// kernel: _lambda_.1
= control target key start
LH: loop header
LB: loop body
LE: loop exit
PB: predicated region body
PF: predicated region fallthrough
CT: control target
= control target key end

     0   :  { %s5359_s0 = inlined_call_operand.vmem [shape: f32[2,8,4], index: 0, kind: input, shape index: {}]   ;;  %s5360_s1 = inlined_call_operand.hbm [shape: f32[12,32], index: 1, kind: input, shape index: {}]   ;;  %s5361_s2 = inlined_call_operand.hbm [shape: f32[16,32], index: 2, kind: input, shape index: {}]   ;;  %s5362_s3 = inlined_call_operand.hbm [shape: f32[16,16], index: 3, kind: input, shape index: {}]   ;;  %s5363_s4 = inlined_call_operand.hbm [shape: f32[2,32,96], index: 4, kind: input, shape index: {}]   ;;  %s5364_s5 = inlined_call_operand.vmem [shape: f32[2,1,96], index: 5, kind: input, shape index: {}]   ;;  %s5365_s6 = inlined_call_operand.hbm [shape: f32[2,32,32], index: 6, kind: input, shape index: {}]   ;;  %s5366_s7 = inlined_call_operand.vmem [shape: f32[2,1,32], index: 7, kind: input, shape index: {}, may-alias: {7,11,13,15}]   ;;  %s5367_s8 = inlined_call_operand.vmem [shape: f32[2,32,64], index: 8, kind: input, shape index: {}]   ;;  %s5368_s9 = inlined_call_operand.vmem [shape: f32[2,1,64], index: 9, kind: input, shape index: {}]   ;;  %s5369_s10 = inlined_call_operand.hbm [shape: f32[2,64,32], index: 10, kind: input, shape index: {}]   ;;  %s5370_s11 = inlined_call_operand.vmem [shape: f32[2,1,32], index: 11, kind: input, shape index: {}, may-alias: {7,11,13,15}]   ;;  %s5371_s12 = inlined_call_operand.vmem [shape: f32[2,1,32], index: 12, kind: input, shape index: {}, may-alias: {12,14}]   ;;  %s5372_s13 = inlined_call_operand.vmem [shape: f32[2,1,32], index: 13, kind: input, shape index: {}, may-alias: {7,11,13,15}]   ;;  %s5373_s14 = inlined_call_operand.vmem [shape: f32[2,1,32], index: 14, kind: input, shape index: {}, may-alias: {12,14}]   ;;  %s5374_s15 = inlined_call_operand.vmem [shape: f32[2,1,32], index: 15, kind: input, shape index: {}, may-alias: {7,11,13,15}]   ;;  %s5375_s16 = inlined_call_operand.vmem [shape: f32[1,32], index: 16, kind: input, shape index: {}]   ;;  %s5376_s17 = inlined_call_operand.vmem [shape: f32[1,32], index: 17, kind: input, shape index: {}]   ;;  %s5377_s18 = inlined_call_operand.vmem [shape: f32[32,4], index: 18, kind: input, shape index: {}]   ;;  %s5378_s19 = inlined_call_operand.vmem [shape: f32[1,4], index: 19, kind: input, shape index: {}]   ;;  %s5379_s20 = inlined_call_operand.hbm [shape: f32[16,16], index: 20, kind: input, shape index: {}]   ;;  %s5380_s21 = inlined_call_operand.vmem [shape: f32[16,1], index: 21, kind: input, shape index: {}]   ;;  %s5381_s22 = inlined_call_operand.vmem [shape: f32[2,8,4], index: 22, kind: output, shape index: {}]  }
   0x1   :  { %5391 = sst [smem:[#allocation17_spill]] %s5359_s0 }
   0x2   :  { %5392 = sst [smem:[#allocation18_spill]] %s5360_s1 }
   0x3   :  { %5393 = sst [smem:[#allocation19_spill]] %s5361_s2 }
   0x4   :  { %5394 = sst [smem:[#allocation20_spill]] %s5362_s3 }
   0x5   :  { %5395 = sst [smem:[#allocation21_spill]] %s5363_s4 }
   0x6   :  { %5396 = sst [smem:[#allocation22_spill]] %s5364_s5 }
   0x7   :  { %5397 = sst [smem:[#allocation23_spill]] %s5365_s6 }
   0x8   :  { %5398 = sst [smem:[#allocation24_spill]] %s5378_s19 }
   0x9   :  { %5399 = sst [smem:[#allocation25_spill]] %s5381_s22 }
   0xa   :  { %27 = vsyncpa [#allocation3], 0 }
   0xb   :  { %28 = vsyncpa [#allocation5], 0 }
   0xc   :  { %29 = vsyncpa [#allocation8], 0 }
   0xd   :  { %30 = vsyncpa [#allocation11], 0  ;;  %s4688_s3 = smov [#allocation4]   ;;  %s4689_s29 = smov [#allocation7]  }
   0xe   :  { %s50_s28 = sshll.u32 %s4688_s3, 4  ;;  %s74_s30 = sshll.u32 %s4689_s29, 4  ;;  %s51_s28 = int_to_ptr.vmem [resolvable:$true] %s50_s28  ;;  %s4826_s30 = int_to_ptr.vmem [resolvable:$true] %s74_s30 }
   0xf   :  { %s5400_s23 = sld [smem:[#allocation19_spill]] }
  0x15   :  { %s4526_s1 = scalar_lea.hbm %s5400_s23, 256 }
  0x16   :  { %p4527_p0 = scmp.ne.s32.totalorder %s5400_s23, %s4526_s1  ;;  %p4530_p1 = scmp.lt.u32.totalorder %s4526_s1, %s5400_s23 }
  0x18   :  { %p4532_p2 = pnand %p4530_p1, %p4527_p0 }
  0x1a   :  { %4535 = shalt.err (!%p4532_p2)
}
  0x1b   :  { %s4536_s26 = scalar_lea.vmem %s51_s28, 256  ;;  %p4541_p4 = scmp.lt.s32.totalorder %s51_s28, %s51_s28 }
  0x1c   :  { %p4537_p3 = scmp.ne.s32.totalorder %s51_s28, %s4536_s26  ;;  %p4542_p5 = scmp.lt.s32.totalorder %s4536_s26, %s4536_s26 }
  0x1e   :  { %p4543_p6 = por %p4542_p5, %p4541_p4 }
  0x20   :  { %p4544_p7 = pnand %p4543_p6, %p4537_p3 }
  0x22   :  { %4547 = shalt.err (!%p4544_p7)
}
  0x23   :  { %s4690_s2 = smov 128   ;;  %s4691_s27 = smov 8  }
  0x24   :  { %56 = dma.hbm_to_vmem [thread:$0]  %s5400_s23, 256, %s51_s28, [#allocation5], %s4690_s2, %s4690_s2, %s4691_s27  }
  0x25   :  { %s5401_s1 = sld [smem:[#allocation21_spill]] }
  0x2b   :  { %s4548_s5 = scalar_lea.hbm %s5401_s1, 1024 }
  0x2c   :  { %p4549_p8 = scmp.ne.s32.totalorder %s5401_s1, %s4548_s5  ;;  %p4552_p9 = scmp.lt.u32.totalorder %s4548_s5, %s5401_s1 }
  0x2e   :  { %p4554_p10 = pnand %p4552_p9, %p4549_p8 }
  0x30   :  { %4557 = shalt.err (!%p4554_p10)
}
  0x31   :  { %s4558_s22 = scalar_lea.vmem %s4826_s30, 1024  ;;  %p4563_p12 = scmp.lt.s32.totalorder %s4826_s30, %s4826_s30 }
  0x32   :  { %p4559_p11 = scmp.ne.s32.totalorder %s4826_s30, %s4558_s22  ;;  %p4564_p13 = scmp.lt.s32.totalorder %s4558_s22, %s4558_s22 }
  0x34   :  { %p4565_p0 = por %p4564_p13, %p4563_p12 }
  0x36   :  { %p4566_p1 = pnand %p4565_p0, %p4559_p11 }
  0x38   :  { %4569 = shalt.err (!%p4566_p1)
}
  0x39   :  { %80 = dma.hbm_to_vmem [thread:$0]  %s5401_s1, 1024, %s4826_s30, [#allocation8], %s4690_s2, %s4690_s2, %s4691_s27  }
  0x3a   :  { %s4692_s3 = smov [#allocation10]   ;;  %s4693_s4 = smov [#allocation2]  }
  0x3b   :  { %s106_s29 = sshll.u32 %s4692_s3, 4  ;;  %s38_s0 = sshll.u32 %s4693_s4, 4  ;;  %s107_s29 = int_to_ptr.vmem [resolvable:$true] %s106_s29  ;;  %s4863_s0 = int_to_ptr.vmem [resolvable:$true] %s38_s0 }
  0x3c   :  { %s4570_s24 = scalar_lea.hbm %s5369_s10, 2048 }
  0x3d   :  { %p4571_p2 = scmp.ne.s32.totalorder %s5369_s10, %s4570_s24  ;;  %p4574_p3 = scmp.lt.u32.totalorder %s4570_s24, %s5369_s10 }
  0x3f   :  { %p4576_p4 = pnand %p4574_p3, %p4571_p2 }
  0x41   :  { %4579 = shalt.err (!%p4576_p4)
}
  0x42   :  { %s4580_s30 = scalar_lea.vmem %s107_s29, 2048  ;;  %p4585_p6 = scmp.lt.s32.totalorder %s107_s29, %s107_s29 }
  0x43   :  { %p4581_p5 = scmp.ne.s32.totalorder %s107_s29, %s4580_s30  ;;  %p4586_p7 = scmp.lt.s32.totalorder %s4580_s30, %s4580_s30 }
  0x45   :  { %p4587_p8 = por %p4586_p7, %p4585_p6 }
  0x47   :  { %p4588_p9 = pnand %p4587_p8, %p4581_p5 }
  0x49   :  { %4591 = shalt.err (!%p4588_p9)
}
  0x4a   :  { %112 = dma.hbm_to_vmem [thread:$0]  %s5369_s10, 2048, %s107_s29, [#allocation11], %s4690_s2, %s4690_s2, %s4691_s27  }
  0x4b   :  { %s5402_s19 = sld [smem:[#allocation18_spill]] }
  0x51   :  { %s4592_s4 = scalar_lea.hbm %s5402_s19, 256 }
  0x52   :  { %p4593_p10 = scmp.ne.s32.totalorder %s5402_s19, %s4592_s4  ;;  %p4596_p11 = scmp.lt.u32.totalorder %s4592_s4, %s5402_s19 }
  0x54   :  { %p4598_p12 = pnand %p4596_p11, %p4593_p10 }
  0x56   :  { %4601 = shalt.err (!%p4598_p12)
}
  0x57   :  { %s4602_s25 = scalar_lea.vmem %s4863_s0, 256  ;;  %p4607_p0 = scmp.lt.s32.totalorder %s4863_s0, %s4863_s0 }
  0x58   :  { %p4603_p13 = scmp.ne.s32.totalorder %s4863_s0, %s4602_s25  ;;  %p4608_p1 = scmp.lt.s32.totalorder %s4602_s25, %s4602_s25 }
  0x5a   :  { %p4609_p2 = por %p4608_p1, %p4607_p0 }
  0x5c   :  { %p4610_p3 = pnand %p4609_p2, %p4603_p13 }
  0x5e   :  { %4613 = shalt.err (!%p4610_p3)
}
  0x5f   :  { %44 = dma.hbm_to_vmem [thread:$0]  %s5402_s19, 256, %s4863_s0, [#allocation3], %s4690_s2, %s4690_s2, %s4691_s27  }
  0x60   :  { %s4694_s26 = smov [#allocation6]   ;;  %s4695_s1 = smov [#allocation9]  }
  0x61   :  { %s62_s30 = sshll.u32 %s4694_s26, 4  ;;  %s88_s28 = sshll.u32 %s4695_s1, 4  ;;  %s63_s30 = int_to_ptr.vmem [resolvable:$true] %s62_s30  ;;  %s4900_s28 = int_to_ptr.vmem [resolvable:$true] %s88_s28 }
  0x62   :  { %s5403_s4 = sld [smem:[#allocation20_spill]] }
  0x68   :  { %s4614_s5 = scalar_lea.hbm %s5403_s4, 256 }
  0x69   :  { %p4615_p4 = scmp.ne.s32.totalorder %s5403_s4, %s4614_s5  ;;  %p4618_p5 = scmp.lt.u32.totalorder %s4614_s5, %s5403_s4 }
  0x6b   :  { %p4620_p6 = pnand %p4618_p5, %p4615_p4 }
  0x6d   :  { %4623 = shalt.err (!%p4620_p6)
}
  0x6e   :  { %s4624_s0 = scalar_lea.vmem %s63_s30, 256  ;;  %p4629_p8 = scmp.lt.s32.totalorder %s63_s30, %s63_s30 }
  0x6f   :  { %p4625_p7 = scmp.ne.s32.totalorder %s63_s30, %s4624_s0  ;;  %p4630_p9 = scmp.lt.s32.totalorder %s4624_s0, %s4624_s0 }
  0x71   :  { %p4631_p10 = por %p4630_p9, %p4629_p8 }
  0x73   :  { %p4632_p11 = pnand %p4631_p10, %p4625_p7 }
  0x75   :  { %4635 = shalt.err (!%p4632_p11)
}
  0x76   :  { %68 = dma.hbm_to_vmem [thread:$0]  %s5403_s4, 256, %s63_s30, [#allocation5], %s4690_s2, %s4690_s2, %s4691_s27  }
  0x77   :  { %s5404_s1 = sld [smem:[#allocation23_spill]] }
  0x7d   :  { %s4636_s23 = scalar_lea.hbm %s5404_s1, 1024 }
  0x7e   :  { %p4637_p12 = scmp.ne.s32.totalorder %s5404_s1, %s4636_s23  ;;  %p4640_p13 = scmp.lt.u32.totalorder %s4636_s23, %s5404_s1 }
  0x80   :  { %p4642_p0 = pnand %p4640_p13, %p4637_p12 }
  0x82   :  { %4645 = shalt.err (!%p4642_p0)
}
  0x83   :  { %s4646_s6 = scalar_lea.vmem %s4900_s28, 1024  ;;  %p4651_p2 = scmp.lt.s32.totalorder %s4900_s28, %s4900_s28 }
  0x84   :  { %p4647_p1 = scmp.ne.s32.totalorder %s4900_s28, %s4646_s6  ;;  %p4652_p3 = scmp.lt.s32.totalorder %s4646_s6, %s4646_s6 }
  0x86   :  { %p4653_p4 = por %p4652_p3, %p4651_p2 }
  0x88   :  { %p4654_p5 = pnand %p4653_p4, %p4647_p1 }
  0x8a   :  { %4657 = shalt.err (!%p4654_p5)
}
  0x8b   :  { %94 = dma.hbm_to_vmem [thread:$0]  %s5404_s1, 1024, %s4900_s28, [#allocation8], %s4690_s2, %s4690_s2, %s4691_s27  }
  0x8c   :  { %s4696_s25 = smov [#allocation12]   ;;  %s4658_s29 = scalar_lea.hbm %s5379_s20, 256 }
  0x8d   :  { %s136_s0 = sshll.u32 %s4696_s25, 4  ;;  %p4659_p6 = scmp.ne.s32.totalorder %s5379_s20, %s4658_s29  ;;  %s137_s0 = int_to_ptr.vmem [resolvable:$true] %s136_s0 }
  0x8e   :  { %p4662_p7 = scmp.lt.u32.totalorder %s4658_s29, %s5379_s20 }
  0x90   :  { %p4664_p8 = pnand %p4662_p7, %p4659_p6 }
  0x92   :  { %4667 = shalt.err (!%p4664_p8)
}
  0x93   :  { %s4668_s22 = scalar_lea.vmem %s137_s0, 256  ;;  %p4673_p10 = scmp.lt.s32.totalorder %s137_s0, %s137_s0 }
  0x94   :  { %p4669_p9 = scmp.ne.s32.totalorder %s137_s0, %s4668_s22  ;;  %p4674_p11 = scmp.lt.s32.totalorder %s4668_s22, %s4668_s22 }
  0x96   :  { %p4675_p12 = por %p4674_p11, %p4673_p10 }
  0x98   :  { %p4676_p13 = pnand %p4675_p12, %p4669_p9 }
  0x9a   :  { %4679 = shalt.err (!%p4676_p13)
}
  0x9b   :  { %142 = dma.hbm_to_vmem [thread:$0]  %s5379_s20, 256, %s137_s0, [#allocation11], %s4690_s2, %s4690_s2, %s4691_s27  }
  0x9c   :  { %4680 = dma.done.wait [#allocation3], 256  }
  0x9d   :  { %4681 = vsyncadd [#allocation3], 4294967040 }
  0x9e   :  { %4682 = dma.done.wait [#allocation5], 512  }
  0x9f   :  { %4683 = vsyncadd [#allocation5], 4294966784 }
  0xa0   :  { %4684 = dma.done.wait [#allocation8], 2048  }
  0xa1   :  { %4685 = vsyncadd [#allocation8], 4294965248 }
  0xa2   :  { %4686 = dma.done.wait [#allocation11], 2304  }
  0xa3   :  { %4687 = vsyncadd [#allocation11], 4294964992  ;;  %vm167_vm0 = vcmask 31744   ;;  %s5405_s30 = sld [smem:[#allocation17_spill]]  ;;  %v252_v50 = vld [vmem:[#allocation2] sm:$0xff]  ;;  %vm263_vm5 = vcmask 1043456  }
  0xa4   :  { %v253_v51 = vld [vmem:[#allocation2 + $0x8] sm:$0xf]  ;;  %vm4697_vm6 = vmmov 1   ;;  %v344_v53 = vld [vmem:[#allocation7] sm:$0xff]  ;;  %v345_v54 = vld [vmem:[#allocation7 + $0x8] sm:$0xff]  ;;  %s4698_s20 = smov 4  }
  0xa5   :  { %v4153_v52 = vpack.c.bf16 %v253_v51, %v252_v50  ;;  %vm4154_vm7 = vmpackc.low %vm263_vm5, %vm4697_vm6  ;;  %v4159_v55 = vpack.c.bf16 %v345_v54, %v344_v53  ;;  %vm208_vm8 = vcmask 64512   ;;  %vm256_vm9 = vcmask 97280   ;;  %s5406_s0 = sld [smem:[#allocation22_spill]]  ;;  %s4699_s19 = smov 88  }
  0xa6   :  { %vm355_vm10 = vcmask 261120   ;;  %s4700_s10 = smov 96   ;;  %s4701_s29 = smov 120   ;;  %vm5017_vm11 = vmpackc.low %vm208_vm8, %vm208_vm8  ;;  %vm530_vm12 = vcmask 130048   ;;  %vm1733_vm13 = vcmask 523264  }
  0xa7   :  { %4155 = vmatprep.subr.msk.bf16.mxu0 %vm4154_vm7, %v4153_v52  ;;  %4160 = vmatprep.subr.bf16.mxu1 %v4159_v55  ;;  %s4702_s26 = smov 112   ;;  %s4703_s23 = smov 80  }
  0xa8   :  { %4158 = vmatpush3.bf16.msk.msra.mxu0 %vm4154_vm7, %v4153_v52  ;;  %4162 = vmatpush3.bf16.msra.mxu1 %v4159_v55  ;;  %s4704_s3 = smov 56   ;;  %s4705_s5 = smov 72  }
  0xa9   :  { %v3632_v0 = vld [vmem:[%s5405_s30 + $0x8] sm:$0xff]  ;;  %v166_v1 = vld [vmem:[%s5405_s30] sm:$0xff]  ;;  %s4706_s22 = smov 64   ;;  %s4707_s28 = smov 104  }
  0xaa   :  { %v212_v2 = vsel %vm167_vm0, %v3632_v0, 0.0  ;;  %v168_v3 = vsel %vm167_vm0, %v166_v1, 0.0  ;;  %s4708_s1 = smov 48   ;;  %s5390_s24 = smov 40  }
  0xab   :  { %v213_v4 = vrot.slane %v212_v2, 4  ;;  %v169_v5 = vrot.slane %v168_v3, 4  ;;  %s5411_s6 = sld [smem:[#allocation25_spill]] }
  0xad   :  { %v214_v6 = vadd.f32 %v213_v4, %v212_v2  ;;  %v170_v7 = vadd.f32 %v169_v5, %v168_v3 }
  0xaf   :  { %v215_v8 = vrot.slane %v214_v6, 2  ;;  %v171_v9 = vrot.slane %v170_v7, 2 }
  0xb1   :  { %v216_v10 = vadd.f32 %v215_v8, %v214_v6  ;;  %v172_v11 = vadd.f32 %v171_v9, %v170_v7  ;;  %v346_v8 = vld [vmem:[#allocation7 + $0x10] sm:$0xff]  ;;  %v347_v9 = vld [vmem:[#allocation7 + $0x18] sm:$0xff] }
  0xb3   :  { %v217_v12 = vrot.slane %v216_v10, 1  ;;  %v173_v13 = vrot.slane %v172_v11, 1 }
  0xb5   :  { %v218_v14 = vadd.f32 %v217_v12, %v216_v10  ;;  %v174_v15 = vadd.f32 %v173_v13, %v172_v11  ;;  %v4163_v10 = vpack.c.bf16 %v347_v9, %v346_v8  ;;  %v254_v11 = vld [vmem:[#allocation4] sm:$0xff]  ;;  %v255_v12 = vld [vmem:[#allocation4 + $0x8] sm:$0xff] }
  0xb7   :  { %v4960_v16 = vmul.f32 0.125, %v218_v14  ;;  %v4962_v17 = vmul.f32 0.125, %v174_v15  ;;  %4164 = vmatprep.subr.bf16.mxu1 %v4163_v10 }
  0xb8   :  { %4166 = vmatpush3.bf16.msra.mxu1 %v4163_v10 }
  0xb9   :  { %v220_v18 = vsub.f32 %v3632_v0, %v4960_v16  ;;  %v177_v19 = vsub.f32 %v166_v1, %v4962_v17 }
  0xbb   :  { %v221_v20 = vmul.f32 %v220_v18, %v220_v18  ;;  %v178_v21 = vmul.f32 %v177_v19, %v177_v19 }
  0xbd   :  { %v222_v22 = vsel %vm167_vm0, %v221_v20, 0.0  ;;  %v179_v23 = vsel %vm167_vm0, %v178_v21, 0.0 }
  0xbe   :  { %v223_v24 = vrot.slane %v222_v22, 4  ;;  %v180_v25 = vrot.slane %v179_v23, 4 }
  0xc0   :  { %v224_v26 = vadd.f32 %v223_v24, %v222_v22  ;;  %v181_v27 = vadd.f32 %v180_v25, %v179_v23 }
  0xc2   :  { %v225_v28 = vrot.slane %v224_v26, 2  ;;  %v182_v29 = vrot.slane %v181_v27, 2 }
  0xc4   :  { %v226_v30 = vadd.f32 %v225_v28, %v224_v26  ;;  %v183_v31 = vadd.f32 %v182_v29, %v181_v27 }
  0xc6   :  { %v227_v32 = vrot.slane %v226_v30, 1  ;;  %v184_v33 = vrot.slane %v183_v31, 1 }
  0xc8   :  { %v228_v34 = vadd.f32 %v227_v32, %v226_v30  ;;  %v185_v35 = vadd.f32 %v184_v33, %v183_v31 }
  0xca   :  { %v229_v36 = vmul.f32 0.125, %v228_v34  ;;  %v186_v37 = vmul.f32 0.125, %v185_v35 }
  0xcc   :  { %v230_v38 = vadd.f32 1e-05, %v229_v36  ;;  %v187_v39 = vadd.f32 1e-05, %v186_v37 }
  0xce   :  { %4432 = vrsqrt.f32 %v230_v38  ;;  %vm233_vm1 = vcmp.eq.f32.partialorder %v230_v38, inf  ;;  %v236_v41 = vand.u32 2147483648, %v230_v38  ;;  %vm235_vm2 = vcmp.eq.f32.partialorder %v230_v38, 0.0 }
  0xcf   :  { %4434 = vrsqrt.f32 %v187_v39  ;;  %vm190_vm3 = vcmp.eq.f32.partialorder %v187_v39, inf  ;;  %v193_v44 = vand.u32 2147483648, %v187_v39  ;;  %vm192_vm4 = vcmp.eq.f32.partialorder %v187_v39, 0.0 }
  0xd8   :  { %v4433_v40 = vpop.eup %4432 }
  0xd9   :  { %v4435_v42 = vpop.eup %4434  ;;  %v232_v43 = vmul.f32 %v4433_v40, %v230_v38 }
  0xda   :  { %v189_v45 = vmul.f32 %v4435_v42, %v187_v39  ;;  %v5039_v42 = vld [vmem:[#allocation6 + $0x8] sm:$0xff] }
  0xdb   :  { %v234_v46 = vsel %vm233_vm1, %v230_v38, %v232_v43  ;;  %v5041_v43 = vld [vmem:[#allocation6] sm:$0xff] }
  0xdc   :  { %v4968_v47 = vsel %vm235_vm2, %v236_v41, %v234_v46  ;;  %v191_v48 = vsel %vm190_vm3, %v187_v39, %v189_v45 }
  0xdd   :  { %4436 = vrcp.f32 %v4968_v47  ;;  %v4971_v49 = vsel %vm192_vm4, %v193_v44, %v191_v48 }
  0xde   :  { %4438 = vrcp.f32 %v4971_v49 }
  0xe7   :  { %v4437_v56 = vpop.eup %4436 }
  0xe8   :  { %v4439_v57 = vpop.eup %4438  ;;  %v239_v58 = vmul.f32 %v4437_v56, %v220_v18 }
  0xe9   :  { %v196_v59 = vmul.f32 %v4439_v57, %v177_v19  ;;  %v3636_v19 = vld [vmem:[%s5406_s0] ss:$0 sm:$0xff] }
  0xea   :  { %243 = vrot.lane.b32.xlu1 %v239_v58, %s4698_s20  ;;  %v241_v60 = vrot.slane %v239_v58, 1  ;;  %v240_v63 = vrot.slane %v239_v58, 7 }
  0xeb   :  { %200 = vrot.lane.b32.xlu0 %v196_v59, %s4698_s20  ;;  %v198_v61 = vrot.slane %v196_v59, 1  ;;  %v197_v1 = vrot.slane %v196_v59, 7 }
  0xee   :  { %247 = vrot.lane.b32.xlu1 %v241_v60, %s4691_s27 }
  0xef   :  { %204 = vrot.lane.b32.xlu0 %v198_v61, %s4691_s27 }
 0x15c   :  { %v244_v62 = vpop.permute.xlu1 %243 }
 0x15d   :  { %v201_v0 = vpop.permute.xlu0 %200  ;;  %v250_v2 = vsel %vm167_vm0, %v240_v63, %v244_v62 }
 0x15e   :  { %v207_v4 = vsel %vm167_vm0, %v197_v1, %v201_v0 }
 0x160   :  { %v248_v3 = vpop.permute.xlu1 %247 }
 0x161   :  { %v251_v5 = vsel %vm208_vm8, %v250_v2, %v248_v3  ;;  %v205_v6 = vpop.permute.xlu0 %204 }
 0x162   :  { %v209_v7 = vsel %vm208_vm8, %v207_v4, %v205_v6 }
 0x163   :  { %3898 = vmatprep.mubr.msk.f32.mxu0 %vm256_vm9, %v209_v7 }
 0x164   :  { %3899 = vmatmul.mubr.msk.f32.vlgmr.msra.gmra.mrb[0].mxu0 %vm256_vm9, %v251_v5 }
 0x237   :  { %v3900_v13 = vpop.f32.mrb[0].mxu0 }
 0x238   :  { %v333_v14 = vpop.f32.mrb[1].mxu0  ;;  %v4982_v18 = vadd.f32 %v3900_v13, %v255_v12 }
 0x239   :  { %v4980_v15 = vadd.f32 %v333_v14, %v254_v11 }
 0x23b   :  { %3909 = vmatprep.mubr.msk.f32.mxu1 %vm355_vm10, %v4980_v15 }
 0x23c   :  { %3910 = vmatmul.mubr.msk.f32.vlgmr.msra.gmra.mrb[0].mxu1 %vm355_vm10, %v4982_v18 }
 0x30f   :  { %v3911_v20 = vpop.f32.mrb[0].mxu1 }
 0x310   :  { %v4991_v21 = vadd.f32 %v3911_v20, %v3636_v19  ;;  %v428_v22 = vpop.f32.mrb[1].mxu1 }
 0x311   :  { %v4993_v23 = vadd.f32 %v3636_v19, %v428_v22 }
 0x313   :  { %3916 = vmatprep.mubr.msk.f32.mxu0 %vm208_vm8, %v4993_v23  ;;  %v4999_v24 = vpack.i.bf16 %v4991_v21, %v4993_v23 }
 0x315   :  { %4356 = vrot.lane.b32.xlu1 %v4999_v24, %s4699_s19  ;;  %4351 = vrot.lane.b32.xlu0 %v4999_v24, %s4700_s10 }
 0x319   :  { %642 = vrot.lane.b32.xlu1 %v4991_v21, %s4701_s29  ;;  %640 = vrot.lane.b32.xlu0 %v4993_v23, %s4701_s29 }
 0x31d   :  { %1002 = vrot.lane.b32.xlu1 %v4993_v23, %s4702_s26  ;;  %4361 = vrot.lane.b32.xlu0 %v4999_v24, %s4703_s23 }
 0x321   :  { %1004 = vrot.lane.b32.xlu0 %v4991_v21, %s4702_s26 }
 0x387   :  { %v4357_v25 = vpop.permute.xlu1 %4356  ;;  %v4352_v26 = vpop.permute.xlu0 %4351 }
 0x388   :  { %v4359_v27 = vunpack.i.h.bf16 %v4357_v25  ;;  %v4358_v28 = vunpack.i.l.bf16 %v4357_v25  ;;  %v4354_v29 = vunpack.i.h.bf16 %v4352_v26  ;;  %v4353_v30 = vunpack.i.l.bf16 %v4352_v26 }
 0x38a   :  { %v4167_v32 = vpack.c.bf16 %v4354_v29, %v4353_v30  ;;  %v4177_v34 = vpack.c.bf16 %v4359_v27, %v4358_v28 }
 0x38b   :  { %v641_v33 = vpop.permute.xlu0 %640  ;;  %v643_v39 = vpop.permute.xlu1 %642 }
 0x38c   :  { %4169 = vmatprep.subr.msk.bf16.mxu0 %vm5017_vm11, %v4167_v32 }
 0x38d   :  { %4172 = vmatpush3.bf16.xpose.msk.msra.mxu0 %vm5017_vm11, %v4167_v32 }
 0x38e   :  { %4179 = vmatprep.subr.msk.bf16.mxu0 %vm5017_vm11, %v4177_v34 }
 0x38f   :  { %v4362_v35 = vpop.permute.xlu0 %4361  ;;  %v1003_v40 = vpop.permute.xlu1 %1002 }
 0x390   :  { %v4364_v36 = vunpack.i.h.bf16 %v4362_v35  ;;  %v4363_v37 = vunpack.i.l.bf16 %v4362_v35 }
 0x392   :  { %v4187_v38 = vpack.c.bf16 %v4364_v36, %v4363_v37 }
 0x393   :  { %v1005_v41 = vpop.permute.xlu0 %1004 }
 0x394   :  { %3917 = vmatmul.mubr.msk.f32.vlgmr.msra.gmra.mrb[2].mxu0 %vm208_vm8, %v4991_v21 }
 0x395   :  { %4182 = vmatpush3.bf16.xpose.msk.msra.mxu0 %vm5017_vm11, %v4177_v34  ;;  %3930 = vmatprep.mubr.msk.f32.mxu0 %vm208_vm8, %v641_v33 }
 0x396   :  { %4189 = vmatprep.subr.msk.bf16.mxu0 %vm5017_vm11, %v4187_v38 }
 0x39c   :  { %3931 = vmatmul.mubr.msk.f32.vlgmr.msra.gmra.mrb[4].mxu0 %vm208_vm8, %v643_v39 }
 0x39d   :  { %4192 = vmatpush3.bf16.xpose.msk.msra.mxu0 %vm5017_vm11, %v4187_v38  ;;  %3954 = vmatprep.mubr.msk.f32.mxu0 %vm208_vm8, %v1003_v40 }
 0x3a4   :  { %3955 = vmatmul.mubr.msk.f32.vlgmr.msra.gmra.mrb[6].mxu0 %vm208_vm8, %v1005_v41 }
 0x467   :  { %v3918_v44 = vpop.f32.mrb[2].mxu0 }
 0x468   :  { %v527_v45 = vadd.f32 %v3918_v44, %v5039_v42  ;;  %v521_v46 = vpop.f32.mrb[3].mxu0 }
 0x469   :  { %v522_v48 = vadd.f32 %v521_v46, %v5041_v43 }
 0x46a   :  { %v534_v50 = vsel %vm530_vm12, %v527_v45, -inf }
 0x46b   :  { %535 = vmax.xlane.f32.xlu0 %v534_v50  ;;  %v531_v51 = vsel %vm530_vm12, %v522_v48, -inf }
 0x46c   :  { %532 = vmax.xlane.f32.xlu1 %v531_v51 }
 0x46f   :  { %v3932_v52 = vpop.f32.mrb[4].mxu0 }
 0x470   :  { %v728_v53 = vadd.f32 %v3932_v52, %v5039_v42  ;;  %v722_v54 = vpop.f32.mrb[5].mxu0 }
 0x471   :  { %v723_v55 = vadd.f32 %v722_v54, %v5041_v43 }
 0x472   :  { %v734_v56 = vsel %vm530_vm12, %v728_v53, -inf }
 0x473   :  { %735 = vmax.xlane.f32.xlu1 %v734_v56  ;;  %v731_v57 = vsel %vm530_vm12, %v723_v55, -inf }
 0x474   :  { %732 = vmax.xlane.f32.xlu0 %v731_v57 }
 0x477   :  { %v3956_v58 = vpop.f32.mrb[6].mxu0 }
 0x478   :  { %v1084_v59 = vpop.f32.mrb[7].mxu0  ;;  %v1090_v22 = vadd.f32 %v3956_v58, %v5039_v42 }
 0x479   :  { %v1085_v20 = vadd.f32 %v1084_v59, %v5041_v43 }
 0x47a   :  { %v1096_v26 = vsel %vm530_vm12, %v1090_v22, -inf }
 0x47b   :  { %v1093_v25 = vsel %vm530_vm12, %v1085_v20, -inf }
 0x4f8   :  { %v536_v60 = vpop.xlane.xlu0 %535 }
 0x4f9   :  { %v538_v61 = vsub.f32 %v527_v45, %v536_v60  ;;  %v533_v62 = vpop.xlane.xlu1 %532 }
 0x4fa   :  { %v537_v63 = vsub.f32 %v522_v48, %v533_v62 }
 0x4fb   :  { %v541_v0 = vmul.f32 1.442695, %v538_v61 }
 0x4fc   :  { %v539_v1 = vmul.f32 1.442695, %v537_v63 }
 0x4fd   :  { %4440 = vpow2.f32 %v541_v0 }
 0x4fe   :  { %4442 = vpow2.f32 %v539_v1  ;;  %v438_v1 = vld [vmem:[#allocation9 + $0x8] sm:$0xff] }
 0x500   :  { %v736_v2 = vpop.xlane.xlu1 %735 }
 0x501   :  { %v738_v3 = vsub.f32 %v728_v53, %v736_v2  ;;  %v733_v4 = vpop.xlane.xlu0 %732  ;;  %v437_v2 = vld [vmem:[#allocation9] sm:$0xff] }
 0x502   :  { %v737_v5 = vsub.f32 %v723_v55, %v733_v4 }
 0x503   :  { %v741_v6 = vmul.f32 1.442695, %v738_v3 }
 0x504   :  { %v739_v7 = vmul.f32 1.442695, %v737_v5 }
 0x505   :  { %4444 = vpow2.f32 %v741_v6 }
 0x506   :  { %4446 = vpow2.f32 %v739_v7 }
 0x507   :  { %v4441_v8 = vpop.eup %4440 }
 0x508   :  { %v4443_v9 = vpop.eup %4442  ;;  %v546_v10 = vsel %vm530_vm12, %v4441_v8, 0.0 }
 0x509   :  { %547 = vadd.xlane.f32.xlu1 %v546_v10  ;;  %v543_v11 = vsel %vm530_vm12, %v4443_v9, 0.0 }
 0x50a   :  { %544 = vadd.xlane.f32.xlu0 %v543_v11 }
 0x50f   :  { %v5053_v12 = vpop.eup %4444 }
 0x510   :  { %v4447_v13 = vpop.eup %4446  ;;  %v746_v14 = vsel %vm530_vm12, %v5053_v12, 0.0 }
 0x511   :  { %747 = vadd.xlane.f32.xlu1 %v746_v14  ;;  %v743_v19 = vsel %vm530_vm12, %v4447_v13, 0.0 }
 0x512   :  { %744 = vadd.xlane.f32.xlu0 %v743_v19 }
 0x522   :  { %4371 = vrot.lane.b32.xlu1 %v4999_v24, %s4704_s3 }
 0x526   :  { %4376 = vrot.lane.b32.xlu1 %v4999_v24, %s4705_s5 }
 0x528   :  { %4366 = vrot.lane.b32.xlu0 %v4999_v24, %s4706_s22 }
 0x52a   :  { %1287 = vrot.lane.b32.xlu1 %v4991_v21, %s4707_s28 }
 0x52c   :  { %1285 = vrot.lane.b32.xlu0 %v4993_v23, %s4707_s28 }
 0x54b   :  { %1094 = vmax.xlane.f32.xlu0 %v1093_v25 }
 0x54e   :  { %1097 = vmax.xlane.f32.xlu1 %v1096_v26 }
 0x55f   :  { %4381 = vrot.lane.b32.xlu1 %v4999_v24, %s4708_s1 }
 0x563   :  { %4386 = vrot.lane.b32.xlu1 %v4999_v24, %s5390_s24 }
 0x596   :  { %v548_v23 = vpop.xlane.xlu1 %547 }
 0x597   :  { %v545_v21 = vpop.xlane.xlu0 %544 }
 0x598   :  { %4448 = vrcp.f32 %v545_v21 }
 0x599   :  { %4450 = vrcp.f32 %v548_v23  ;;  %v439_v23 = vld [vmem:[#allocation9 + $0x10] sm:$0xff] }
 0x59e   :  { %v748_v27 = vpop.xlane.xlu1 %747 }
 0x59f   :  { %v745_v28 = vpop.xlane.xlu0 %744 }
 0x5a0   :  { %4452 = vrcp.f32 %v745_v28 }
 0x5a1   :  { %4454 = vrcp.f32 %v748_v27 }
 0x5a2   :  { %v4449_v29 = vpop.eup %4448  ;;  %v4372_v30 = vpop.permute.xlu1 %4371 }
 0x5a3   :  { %v4367_v32 = vpop.permute.xlu0 %4366  ;;  %v551_v33 = vmul.f32 %v4449_v29, %v4443_v9  ;;  %v4374_v34 = vunpack.i.h.bf16 %v4372_v30  ;;  %v4373_v35 = vunpack.i.l.bf16 %v4372_v30  ;;  %v4451_v39 = vpop.eup %4450 }
 0x5a4   :  { %v4369_v36 = vunpack.i.h.bf16 %v4367_v32  ;;  %v4368_v37 = vunpack.i.l.bf16 %v4367_v32  ;;  %v552_v50 = vmul.f32 %v4451_v39, %v4441_v8 }
 0x5a5   :  { %3923 = vmatprep.mubr.msk.f32.mxu1 %vm530_vm12, %v551_v33  ;;  %v4183_v45 = vpack.c.bf16 %v4374_v34, %v4373_v35 }
 0x5a6   :  { %v4173_v38 = vpack.c.bf16 %v4369_v36, %v4368_v37  ;;  %v4377_v24 = vpop.permute.xlu1 %4376 }
 0x5a7   :  { %v4379_v40 = vunpack.i.h.bf16 %v4377_v24  ;;  %v4378_v41 = vunpack.i.l.bf16 %v4377_v24  ;;  %v1286_v44 = vpop.permute.xlu0 %1285 }
 0x5a8   :  { %4174 = vmatprep.subr.bf16.mxu1 %v4173_v38  ;;  %3973 = vmatprep.mubr.msk.f32.mxu0 %vm208_vm8, %v1286_v44 }
 0x5a9   :  { %v4197_v46 = vpack.c.bf16 %v4379_v40, %v4378_v41  ;;  %4176 = vmatpush3.bf16.msra.mxu1 %v4173_v38 }
 0x5aa   :  { %v4453_v48 = vpop.eup %4452  ;;  %4184 = vmatprep.subr.bf16.mxu1 %v4183_v45  ;;  %v1288_v54 = vpop.permute.xlu1 %1287 }
 0x5ab   :  { %v4455_v51 = vpop.eup %4454  ;;  %4199 = vmatprep.subr.msk.bf16.mxu0 %vm5017_vm11, %v4197_v46  ;;  %v751_v52 = vmul.f32 %v4453_v48, %v4447_v13  ;;  %v440_v48 = vld [vmem:[#allocation9 + $0x18] sm:$0xff] }
 0x5ac   :  { %3924 = vmatmul.mubr.msk.f32.vlgmr.msra.gmra.mrb[2].mxu1 %vm530_vm12, %v552_v50  ;;  %4202 = vmatpush3.bf16.xpose.msk.msra.mxu0 %vm5017_vm11, %v4197_v46  ;;  %v752_v53 = vmul.f32 %v4455_v51, %v5053_v12 }
 0x5ad   :  { %4186 = vmatpush3.bf16.msra.mxu1 %v4183_v45  ;;  %3937 = vmatprep.mubr.msk.f32.mxu1 %vm530_vm12, %v751_v52 }
 0x5ae   :  { %3940 = vmatprep.subr.mxu1 %v438_v1 }
 0x5b0   :  { %3938 = vmatmul.mubr.msk.f32.vlgmr.msra.gmra.mrb[4].mxu1 %vm530_vm12, %v752_v53 }
 0x5b1   :  { %3941 = vmatpush3.msra.mxu1 %v438_v1 }
 0x5b2   :  { %3945 = vmatprep.subr.mxu1 %v437_v2 }
 0x5b3   :  { %3974 = vmatmul.mubr.msk.f32.vlgmr.msra.gmra.mrb[8].mxu0 %vm208_vm8, %v1288_v54 }
 0x5d8   :  { %v1095_v55 = vpop.xlane.xlu0 %1094 }
 0x5d9   :  { %v1099_v56 = vsub.f32 %v1085_v20, %v1095_v55 }
 0x5db   :  { %v1101_v57 = vmul.f32 1.442695, %v1099_v56  ;;  %v1098_v58 = vpop.xlane.xlu1 %1097 }
 0x5dc   :  { %v1100_v59 = vsub.f32 %v1090_v22, %v1098_v58  ;;  %v3671_v58 = vld [vmem:[%s5366_s7] ss:$0 sm:$0xff] }
 0x5dd   :  { %4456 = vpow2.f32 %v1101_v57 }
 0x5de   :  { %v1103_v60 = vmul.f32 1.442695, %v1100_v59 }
 0x5df   :  { %v4382_v4 = vpop.permute.xlu1 %4381 }
 0x5e0   :  { %4458 = vpow2.f32 %v1103_v60  ;;  %v4384_v8 = vunpack.i.h.bf16 %v4382_v4  ;;  %v4383_v9 = vunpack.i.l.bf16 %v4382_v4 }
 0x5e2   :  { %v4193_v12 = vpack.c.bf16 %v4384_v8, %v4383_v9 }
 0x5e3   :  { %v4387_v26 = vpop.permute.xlu1 %4386 }
 0x5e4   :  { %v4389_v27 = vunpack.i.h.bf16 %v4387_v26  ;;  %v4388_v28 = vunpack.i.l.bf16 %v4387_v26  ;;  %v1720_v26 = vld [vmem:[#allocation10 + $0x10] sm:$0xff] }
 0x5e6   :  { %v4203_v33 = vpack.c.bf16 %v4389_v27, %v4388_v28  ;;  %v1722_v28 = vld [vmem:[#allocation10 + $0x20] sm:$0xff] }
 0x5e7   :  { %v4457_v61 = vpop.eup %4456 }
 0x5e8   :  { %v1105_v62 = vsel %vm530_vm12, %v4457_v61, 0.0 }
 0x5e9   :  { %1106 = vadd.xlane.f32.xlu0 %v1105_v62 }
 0x5ea   :  { %v4459_v63 = vpop.eup %4458 }
 0x5eb   :  { %v1108_v0 = vsel %vm530_vm12, %v4459_v63, 0.0 }
 0x5ed   :  { %1109 = vadd.xlane.f32.xlu0 %v1108_v0 }
 0x676   :  { %v1107_v3 = vpop.xlane.xlu0 %1106 }
 0x677   :  { %4460 = vrcp.f32 %v1107_v3 }
 0x67a   :  { %v1110_v6 = vpop.xlane.xlu0 %1109 }
 0x67b   :  { %4462 = vrcp.f32 %v1110_v6 }
 0x67f   :  { %v3925_v5 = vpop.f32.mrb[2].mxu1 }
 0x680   :  { %v631_v7 = vpop.f32.mrb[3].mxu1 }
 0x681   :  { %v4461_v25 = vpop.eup %4460 }
 0x682   :  { %v1113_v30 = vmul.f32 %v4461_v25, %v4457_v61  ;;  %v1719_v25 = vld [vmem:[#allocation10 + $0x8] sm:$0xff] }
 0x683   :  { %v3939_v10 = vpop.f32.mrb[4].mxu1 }
 0x684   :  { %v831_v11 = vpop.f32.mrb[5].mxu1 }
 0x685   :  { %3942 = vmatprep.mubr.msk.f32.mxu1 %vm208_vm8, %v831_v11  ;;  %v4463_v21 = vpop.eup %4462 }
 0x686   :  { %3943 = vmatmul.mubr.msk.f32.vlgmr.msra.gmra.mrb[6].mxu1 %vm208_vm8, %v3939_v10  ;;  %v3975_v13 = vpop.f32.mrb[8].mxu0  ;;  %v1114_v32 = vmul.f32 %v4463_v21, %v4459_v63 }
 0x687   :  { %3946 = vmatpush3.msra.mxu1 %v437_v2  ;;  %3947 = vmatprep.mubr.msk.f32.mxu1 %vm208_vm8, %v631_v7  ;;  %v1367_v14 = vpop.f32.mrb[9].mxu0  ;;  %v1373_v20 = vadd.f32 %v3975_v13, %v5039_v42 }
 0x688   :  { %4194 = vmatprep.subr.bf16.mxu1 %v4193_v12  ;;  %v1368_v19 = vadd.f32 %v1367_v14, %v5041_v43  ;;  %v1626_v14 = vld [vmem:[%s5367_s8 + $0x10] sm:$0xff] }
 0x689   :  { %v1379_v29 = vsel %vm530_vm12, %v1373_v20, -inf }
 0x68a   :  { %v1376_v22 = vsel %vm530_vm12, %v1368_v19, -inf }
 0x68b   :  { %1377 = vmax.xlane.f32.xlu0 %v1376_v22  ;;  %v1718_v22 = vld [vmem:[#allocation10] sm:$0xff] }
 0x68c   :  { %v4215_v21 = vpack.c.bf16 %v1719_v25, %v1718_v22  ;;  %v1864_v22 = vld [vmem:[#allocation7 + $0x30] sm:$0xff]  ;;  %v1865_v25 = vld [vmem:[#allocation7 + $0x38] sm:$0xff] }
 0x68e   :  { %3948 = vmatmul.mubr.msk.f32.vlgmr.msra.gmra.mrb[6].mxu1 %vm208_vm8, %v3925_v5 }
 0x68f   :  { %4196 = vmatpush3.bf16.msra.mxu1 %v4193_v12  ;;  %1380 = vmax.xlane.f32.xlu0 %v1379_v29  ;;  %v1625_v12 = vld [vmem:[%s5367_s8 + $0x8] sm:$0xff] }
 0x690   :  { %3961 = vmatprep.mubr.msk.f32.mxu1 %vm530_vm12, %v1113_v30  ;;  %3964 = vmatprep.subr.mxu1 %v439_v23  ;;  %v1723_v29 = vld [vmem:[#allocation10 + $0x28] sm:$0xff] }
 0x691   :  { %v4223_v30 = vpack.c.bf16 %v1723_v29, %v1722_v28 }
 0x692   :  { %3962 = vmatmul.mubr.msk.f32.vlgmr.msra.gmra.mrb[8].mxu1 %vm530_vm12, %v1114_v32 }
 0x693   :  { %3965 = vmatpush3.msra.mxu1 %v439_v23  ;;  %v1721_v23 = vld [vmem:[#allocation10 + $0x18] sm:$0xff] }
 0x694   :  { %4204 = vmatprep.subr.bf16.mxu1 %v4203_v33  ;;  %v4219_v27 = vpack.c.bf16 %v1721_v23, %v1720_v26  ;;  %v4235_v26 = vpack.c.bf16 %v1865_v25, %v1864_v22 }
 0x718   :  { %v1378_v34 = vpop.xlane.xlu0 %1377 }
 0x719   :  { %v1382_v35 = vsub.f32 %v1368_v19, %v1378_v34  ;;  %v1627_v19 = vld [vmem:[%s5367_s8 + $0x18] sm:$0xff] }
 0x71b   :  { %v1384_v36 = vmul.f32 1.442695, %v1382_v35 }
 0x71c   :  { %v1381_v37 = vpop.xlane.xlu0 %1380 }
 0x71d   :  { %4464 = vpow2.f32 %v1384_v36  ;;  %v1383_v38 = vsub.f32 %v1373_v20, %v1381_v37  ;;  %v4211_v20 = vpack.c.bf16 %v1627_v19, %v1626_v14  ;;  %v1862_v14 = vld [vmem:[#allocation7 + $0x20] sm:$0xff]  ;;  %v1863_v19 = vld [vmem:[#allocation7 + $0x28] sm:$0xff] }
 0x71f   :  { %v1386_v24 = vmul.f32 1.442695, %v1383_v38 }
 0x721   :  { %4466 = vpow2.f32 %v1386_v24  ;;  %v3672_v24 = vld [vmem:[%s5371_s12] ss:$0 sm:$0xff] }
 0x727   :  { %v4465_v39 = vpop.eup %4464 }
 0x728   :  { %v1388_v40 = vsel %vm530_vm12, %v4465_v39, 0.0 }
 0x729   :  { %1389 = vadd.xlane.f32.xlu0 %v1388_v40  ;;  %v3673_v40 = vld [vmem:[%s5372_s13] ss:$0 sm:$0xff] }
 0x72b   :  { %v4467_v41 = vpop.eup %4466 }
 0x72c   :  { %v1391_v44 = vsel %vm530_vm12, %v4467_v41, 0.0 }
 0x72d   :  { %1392 = vadd.xlane.f32.xlu0 %v1391_v44 }
 0x765   :  { %v3963_v45 = vpop.f32.mrb[8].mxu1 }
 0x766   :  { %v1193_v46 = vpop.f32.mrb[9].mxu1 }
 0x767   :  { %3966 = vmatprep.mubr.msk.f32.mxu1 %vm208_vm8, %v1193_v46 }
 0x768   :  { %3967 = vmatmul.mubr.msk.f32.vlgmr.msra.gmra.mrb[6].mxu1 %vm208_vm8, %v3963_v45 }
 0x769   :  { %4206 = vmatpush3.bf16.msra.mxu1 %v4203_v33 }
 0x76a   :  { %3983 = vmatprep.subr.mxu1 %v440_v48 }
 0x7b6   :  { %v1390_v50 = vpop.xlane.xlu0 %1389 }
 0x7b7   :  { %4468 = vrcp.f32 %v1390_v50 }
 0x7ba   :  { %v1393_v51 = vpop.xlane.xlu0 %1392 }
 0x7bb   :  { %4470 = vrcp.f32 %v1393_v51  ;;  %v1724_v51 = vld [vmem:[#allocation10 + $0x30] sm:$0xff] }
 0x7c1   :  { %v4469_v52 = vpop.eup %4468 }
 0x7c2   :  { %v1396_v53 = vmul.f32 %v4469_v52, %v4465_v39  ;;  %v1725_v52 = vld [vmem:[#allocation10 + $0x38] sm:$0xff] }
 0x7c4   :  { %3980 = vmatprep.mubr.msk.f32.mxu1 %vm530_vm12, %v1396_v53  ;;  %v4227_v53 = vpack.c.bf16 %v1725_v52, %v1724_v51 }
 0x7c5   :  { %v4471_v54 = vpop.eup %4470 }
 0x7c6   :  { %v1397_v55 = vmul.f32 %v4471_v54, %v4467_v41  ;;  %v3674_v54 = vld [vmem:[%s5368_s9] ss:$0 sm:$0xff] }
 0x7c8   :  { %3981 = vmatmul.mubr.msk.f32.vlgmr.msra.gmra.mrb[10].mxu1 %vm530_vm12, %v1397_v55 }
 0x7c9   :  { %3984 = vmatpush3.msra.mxu1 %v440_v48 }
 0x7ca   :  { %4216 = vmatprep.subr.bf16.mxu1 %v4215_v21 }
 0x89b   :  { %v3982_v56 = vpop.f32.mrb[10].mxu1 }
 0x89c   :  { %v1476_v57 = vpop.f32.mrb[11].mxu1 }
 0x89d   :  { %3985 = vmatprep.mubr.msk.f32.mxu1 %vm208_vm8, %v1476_v57 }
 0x89e   :  { %3986 = vmatmul.mubr.msk.f32.vlgmr.msra.gmra.mrb[6].mxu1 %vm208_vm8, %v3982_v56 }
 0x89f   :  { %4218 = vmatpush3.bf16.msra.mxu1 %v4215_v21 }
 0x8a0   :  { %4220 = vmatprep.subr.bf16.mxu1 %v4219_v27 }
 0x8a3   :  { %4222 = vmatpush3.bf16.msra.mxu1 %v4219_v27 }
 0x8a4   :  { %4224 = vmatprep.subr.bf16.mxu1 %v4223_v30 }
 0x8a7   :  { %4226 = vmatpush3.bf16.msra.mxu1 %v4223_v30 }
 0x8a8   :  { %4228 = vmatprep.subr.bf16.mxu1 %v4227_v53 }
 0x8ab   :  { %4230 = vmatpush3.bf16.msra.mxu1 %v4227_v53 }
 0x971   :  { %v3987_v59 = vpop.f32.mrb[6].mxu1 }
 0x972   :  { %v1576_v60 = vadd.f32 %v3987_v59, %v3671_v58  ;;  %v1557_v61 = vpop.f32.mrb[7].mxu1 }
 0x973   :  { %v1575_v62 = vadd.f32 %v3671_v58, %v1557_v61  ;;  %v3677_v61 = vld [vmem:[%s5370_s11] ss:$0 sm:$0xff] }
 0x974   :  { %v1578_v63 = vadd.f32 %v1576_v60, %v4982_v18 }
 0x975   :  { %v1577_v0 = vadd.f32 %v1575_v62, %v4980_v15  ;;  %v1624_v15 = vld [vmem:[%s5367_s8] sm:$0xff] }
 0x976   :  { %v1584_v1 = vsel %vm355_vm10, %v1578_v63, 0.0  ;;  %v4207_v13 = vpack.c.bf16 %v1625_v12, %v1624_v15 }
 0x977   :  { %1585 = vadd.xlane.f32.xlu1 %v1584_v1  ;;  %v1581_v2 = vsel %vm355_vm10, %v1577_v0, 0.0 }
 0x978   :  { %1582 = vadd.xlane.f32.xlu0 %v1581_v2  ;;  %4208 = vmatprep.subr.bf16.mxu0 %v4207_v13 }
 0x979   :  { %4210 = vmatpush3.bf16.msra.mxu0 %v4207_v13 }
 0x97a   :  { %4212 = vmatprep.subr.bf16.mxu0 %v4211_v20 }
 0x97d   :  { %4214 = vmatpush3.bf16.msra.mxu0 %v4211_v20  ;;  %v4231_v20 = vpack.c.bf16 %v1863_v19, %v1862_v14 }
 0x97f   :  { %4232 = vmatprep.subr.bf16.mxu0 %v4231_v20 }
 0xa04   :  { %v1586_v3 = vpop.xlane.xlu1 %1585 }
 0xa05   :  { %v1589_v4 = vmul.f32 0.03125, %v1586_v3  ;;  %v1583_v5 = vpop.xlane.xlu0 %1582 }
 0xa06   :  { %v1588_v6 = vmul.f32 0.03125, %v1583_v5 }
 0xa07   :  { %v1591_v7 = vsub.f32 %v1578_v63, %v1589_v4 }
 0xa08   :  { %v1590_v8 = vsub.f32 %v1577_v0, %v1588_v6 }
 0xa09   :  { %v1593_v11 = vmul.f32 %v1591_v7, %v1591_v7 }
 0xa0a   :  { %v1592_v9 = vmul.f32 %v1590_v8, %v1590_v8 }
 0xa0b   :  { %v1597_v18 = vsel %vm355_vm10, %v1593_v11, 0.0 }
 0xa0c   :  { %v1594_v10 = vsel %vm355_vm10, %v1592_v9, 0.0 }
 0xa0d   :  { %1595 = vadd.xlane.f32.xlu0 %v1594_v10 }
 0xa11   :  { %1598 = vadd.xlane.f32.xlu0 %v1597_v18 }
 0xa9a   :  { %v1596_v32 = vpop.xlane.xlu0 %1595 }
 0xa9b   :  { %v1600_v33 = vmul.f32 0.03125, %v1596_v32 }
 0xa9d   :  { %v1602_v34 = vadd.f32 1e-05, %v1600_v33  ;;  %v3680_v33 = vld [vmem:[%s5373_s14] ss:$0 sm:$0xff] }
 0xa9e   :  { %v1599_v35 = vpop.xlane.xlu0 %1598 }
 0xa9f   :  { %4472 = vrsqrt.f32 %v1602_v34  ;;  %v1601_v36 = vmul.f32 0.03125, %v1599_v35  ;;  %v3681_v35 = vld [vmem:[%s5374_s15] ss:$0 sm:$0xff] }
 0xaa1   :  { %v1603_v37 = vadd.f32 1e-05, %v1601_v36 }
 0xaa3   :  { %4474 = vrsqrt.f32 %v1603_v37 }
 0xaa9   :  { %v4473_v38 = vpop.eup %4472 }
 0xaaa   :  { %v1606_v39 = vmul.f32 %v4473_v38, %v1590_v8 }
 0xaac   :  { %v1614_v41 = vmul.f32 %v3672_v24, %v1606_v39 }
 0xaad   :  { %v4475_v44 = vpop.eup %4474 }
 0xaae   :  { %v1607_v45 = vmul.f32 %v4475_v44, %v1591_v7  ;;  %v1622_v46 = vadd.f32 %v3673_v40, %v1614_v41  ;;  %v3683_v41 = vld [vmem:[%s5406_s0 + $0x1] ss:$0 sm:$0xff]  ;;  %s5409_s0 = smov 40  }
 0xab0   :  { %v1615_v48 = vmul.f32 %v3672_v24, %v1607_v45  ;;  %3996 = vmatprep.mubr.msk.f32.mxu0 %vm355_vm10, %v1622_v46 }
 0xab2   :  { %v1623_v50 = vadd.f32 %v3673_v40, %v1615_v48 }
 0xab4   :  { %3997 = vmatmul.mubr.msk.f32.vlgmr.msra.gmra.mrb[10].mxu0 %vm355_vm10, %v1623_v50 }
 0xab5   :  { %4234 = vmatpush3.bf16.msra.mxu0 %v4231_v20 }
 0xab6   :  { %4236 = vmatprep.subr.bf16.mxu0 %v4235_v26 }
 0xab9   :  { %4238 = vmatpush3.bf16.msra.mxu0 %v4235_v26 }
 0xb87   :  { %v3998_v55 = vpop.f32.mrb[10].mxu0 }
 0xb88   :  { %v1713_v56 = vadd.f32 %v3998_v55, %v3674_v54  ;;  %v1707_v57 = vpop.f32.mrb[11].mxu0 }
 0xb89   :  { %v1708_v58 = vadd.f32 %v3674_v54, %v1707_v57 }
 0xb8a   :  { %v1717_v60 = vmax.f32 %v1713_v56, 0.0 }
 0xb8b   :  { %v1716_v59 = vmax.f32 %v1708_v58, 0.0 }
 0xb8d   :  { %4015 = vmatprep.mubr.msk.f32.mxu1 %vm1733_vm13, %v1716_v59 }
 0xb8e   :  { %4016 = vmatmul.mubr.msk.f32.vlgmr.msra.gmra.mrb[12].mxu1 %vm1733_vm13, %v1717_v60 }
 0xc61   :  { %v4017_v62 = vpop.f32.mrb[12].mxu1 }
 0xc62   :  { %v1806_v63 = vpop.f32.mrb[13].mxu1  ;;  %v1812_v0 = vadd.f32 %v4017_v62, %v3677_v61 }
 0xc63   :  { %v1807_v1 = vadd.f32 %v3677_v61, %v1806_v63 }
 0xc64   :  { %v1816_v4 = vadd.f32 %v1812_v0, %v1623_v50 }
 0xc65   :  { %v1815_v2 = vadd.f32 %v1807_v1, %v1622_v46 }
 0xc66   :  { %v1822_v5 = vsel %vm355_vm10, %v1816_v4, 0.0 }
 0xc67   :  { %v1819_v3 = vsel %vm355_vm10, %v1815_v2, 0.0 }
 0xc68   :  { %1820 = vadd.xlane.f32.xlu0 %v1819_v3 }
 0xc6c   :  { %1823 = vadd.xlane.f32.xlu0 %v1822_v5 }
 0xcf5   :  { %v1821_v6 = vpop.xlane.xlu0 %1820 }
 0xcf6   :  { %v1825_v7 = vmul.f32 0.03125, %v1821_v6 }
 0xcf8   :  { %v1827_v8 = vsub.f32 %v1815_v2, %v1825_v7 }
 0xcf9   :  { %v1824_v9 = vpop.xlane.xlu0 %1823 }
 0xcfa   :  { %v1826_v10 = vmul.f32 0.03125, %v1824_v9  ;;  %v1829_v11 = vmul.f32 %v1827_v8, %v1827_v8 }
 0xcfc   :  { %v1828_v18 = vsub.f32 %v1816_v4, %v1826_v10  ;;  %v1831_v15 = vsel %vm355_vm10, %v1829_v11, 0.0 }
 0xcfd   :  { %1832 = vadd.xlane.f32.xlu0 %v1831_v15 }
 0xcfe   :  { %v1830_v12 = vmul.f32 %v1828_v18, %v1828_v18 }
 0xd00   :  { %v1834_v13 = vsel %vm355_vm10, %v1830_v12, 0.0 }
 0xd01   :  { %1835 = vadd.xlane.f32.xlu0 %v1834_v13 }
 0xd8a   :  { %v1833_v21 = vpop.xlane.xlu0 %1832 }
 0xd8b   :  { %v1837_v23 = vmul.f32 0.03125, %v1833_v21 }
 0xd8d   :  { %v1839_v27 = vadd.f32 1e-05, %v1837_v23 }
 0xd8e   :  { %v1836_v28 = vpop.xlane.xlu0 %1835 }
 0xd8f   :  { %4476 = vrsqrt.f32 %v1839_v27  ;;  %v1838_v29 = vmul.f32 0.03125, %v1836_v28 }
 0xd91   :  { %v1840_v30 = vadd.f32 1e-05, %v1838_v29 }
 0xd93   :  { %4478 = vrsqrt.f32 %v1840_v30 }
 0xd99   :  { %v4477_v32 = vpop.eup %4476 }
 0xd9a   :  { %v1843_v34 = vmul.f32 %v4477_v32, %v1827_v8 }
 0xd9c   :  { %v1851_v36 = vmul.f32 %v3680_v33, %v1843_v34 }
 0xd9d   :  { %v4479_v37 = vpop.eup %4478 }
 0xd9e   :  { %v1844_v38 = vmul.f32 %v4479_v37, %v1828_v18  ;;  %v5154_v24 = vadd.f32 %v3681_v35, %v1851_v36 }
 0xda0   :  { %v1852_v39 = vmul.f32 %v3680_v33, %v1844_v38  ;;  %4026 = vmatprep.mubr.msk.f32.mxu0 %vm355_vm10, %v5154_v24 }
 0xda2   :  { %v5158_v40 = vadd.f32 %v3681_v35, %v1852_v39 }
 0xda4   :  { %4027 = vmatmul.mubr.msk.f32.vlgmr.msra.gmra.mrb[12].mxu0 %vm355_vm10, %v5158_v40 }
 0xe77   :  { %v4028_v44 = vpop.f32.mrb[12].mxu0 }
 0xe78   :  { %v5165_v45 = vadd.f32 %v4028_v44, %v3683_v41  ;;  %v1946_v46 = vpop.f32.mrb[13].mxu0 }
 0xe79   :  { %v5167_v48 = vadd.f32 %v3683_v41, %v1946_v46 }
 0xe7b   :  { %4033 = vmatprep.mubr.msk.f32.mxu0 %vm208_vm8, %v5167_v48  ;;  %v5173_v50 = vpack.i.bf16 %v5165_v45, %v5167_v48 }
 0xe7d   :  { %4396 = vrot.lane.b32.xlu1 %v5173_v50, %s4699_s19  ;;  %4391 = vrot.lane.b32.xlu0 %v5173_v50, %s4700_s10 }
 0xe81   :  { %4401 = vrot.lane.b32.xlu1 %v5173_v50, %s4703_s23  ;;  %2158 = vrot.lane.b32.xlu0 %v5167_v48, %s4701_s29 }
 0xe85   :  { %2522 = vrot.lane.b32.xlu1 %v5165_v45, %s4702_s26  ;;  %2160 = vrot.lane.b32.xlu0 %v5165_v45, %s4701_s29 }
 0xe89   :  { %2520 = vrot.lane.b32.xlu0 %v5167_v48, %s4702_s26 }
 0xeef   :  { %v4397_v51 = vpop.permute.xlu1 %4396  ;;  %v4392_v52 = vpop.permute.xlu0 %4391 }
 0xef0   :  { %v4399_v53 = vunpack.i.h.bf16 %v4397_v51  ;;  %v4398_v54 = vunpack.i.l.bf16 %v4397_v51  ;;  %v4394_v55 = vunpack.i.h.bf16 %v4392_v52  ;;  %v4393_v56 = vunpack.i.l.bf16 %v4392_v52 }
 0xef2   :  { %v4239_v57 = vpack.c.bf16 %v4394_v55, %v4393_v56  ;;  %v4249_v58 = vpack.c.bf16 %v4399_v53, %v4398_v54 }
 0xef3   :  { %v4402_v59 = vpop.permute.xlu1 %4401  ;;  %v2159_v62 = vpop.permute.xlu0 %2158 }
 0xef4   :  { %4241 = vmatprep.subr.msk.bf16.mxu0 %vm5017_vm11, %v4239_v57  ;;  %v4404_v60 = vunpack.i.h.bf16 %v4402_v59  ;;  %v4403_v61 = vunpack.i.l.bf16 %v4402_v59 }
 0xef5   :  { %4244 = vmatpush3.bf16.xpose.msk.msra.mxu0 %vm5017_vm11, %v4239_v57 }
 0xef6   :  { %4251 = vmatprep.subr.msk.bf16.mxu0 %vm5017_vm11, %v4249_v58  ;;  %v4259_v63 = vpack.c.bf16 %v4404_v60, %v4403_v61 }
 0xef7   :  { %v2161_v0 = vpop.permute.xlu0 %2160  ;;  %v2523_v2 = vpop.permute.xlu1 %2522 }
 0xefb   :  { %v2521_v1 = vpop.permute.xlu0 %2520 }
 0xefc   :  { %4034 = vmatmul.mubr.msk.f32.vlgmr.msra.gmra.mrb[14].mxu0 %vm208_vm8, %v5165_v45 }
 0xefd   :  { %4254 = vmatpush3.bf16.xpose.msk.msra.mxu0 %vm5017_vm11, %v4249_v58  ;;  %4047 = vmatprep.mubr.msk.f32.mxu0 %vm208_vm8, %v2159_v62 }
 0xefe   :  { %4261 = vmatprep.subr.msk.bf16.mxu0 %vm5017_vm11, %v4259_v63 }
 0xf04   :  { %4048 = vmatmul.mubr.msk.f32.vlgmr.msra.gmra.mrb[16].mxu0 %vm208_vm8, %v2161_v0 }
 0xf05   :  { %4264 = vmatpush3.bf16.xpose.msk.msra.mxu0 %vm5017_vm11, %v4259_v63  ;;  %4071 = vmatprep.mubr.msk.f32.mxu0 %vm208_vm8, %v2521_v1 }
 0xf0c   :  { %4072 = vmatmul.mubr.msk.f32.vlgmr.msra.gmra.mrb[18].mxu0 %vm208_vm8, %v2523_v2 }
 0xfcf   :  { %v4035_v3 = vpop.f32.mrb[14].mxu0 }
 0xfd0   :  { %v2046_v4 = vadd.f32 %v4035_v3, %v5039_v42  ;;  %v2040_v5 = vpop.f32.mrb[15].mxu0 }
 0xfd1   :  { %v2041_v6 = vadd.f32 %v2040_v5, %v5041_v43 }
 0xfd2   :  { %v2052_v7 = vsel %vm530_vm12, %v2046_v4, -inf }
 0xfd3   :  { %2053 = vmax.xlane.f32.xlu1 %v2052_v7  ;;  %v2049_v8 = vsel %vm530_vm12, %v2041_v6, -inf }
 0xfd4   :  { %2050 = vmax.xlane.f32.xlu0 %v2049_v8 }
 0xfd7   :  { %v4049_v9 = vpop.f32.mrb[16].mxu0 }
 0xfd8   :  { %v2240_v10 = vpop.f32.mrb[17].mxu0  ;;  %v2246_v18 = vadd.f32 %v4049_v9, %v5039_v42 }
 0xfd9   :  { %v2241_v11 = vadd.f32 %v2240_v10, %v5041_v43 }
 0xfda   :  { %v2252_v13 = vsel %vm530_vm12, %v2246_v18, -inf }
 0xfdb   :  { %v2249_v15 = vsel %vm530_vm12, %v2241_v11, -inf }
 0xfdc   :  { %2250 = vmax.xlane.f32.xlu0 %v2249_v15 }
 0xfdf   :  { %v4073_v12 = vpop.f32.mrb[18].mxu0 }
 0xfe0   :  { %v2602_v14 = vpop.f32.mrb[19].mxu0  ;;  %2253 = vmax.xlane.f32.xlu0 %v2252_v13  ;;  %v2608_v44 = vadd.f32 %v4073_v12, %v5039_v42 }
 0xfe1   :  { %v2603_v46 = vadd.f32 %v2602_v14, %v5041_v43 }
 0xfe2   :  { %v2614_v52 = vsel %vm530_vm12, %v2608_v44, -inf }
 0xfe3   :  { %v2611_v51 = vsel %vm530_vm12, %v2603_v46, -inf }
0x1060   :  { %v2054_v19 = vpop.xlane.xlu1 %2053 }
0x1061   :  { %v2056_v20 = vsub.f32 %v2046_v4, %v2054_v19  ;;  %v2051_v22 = vpop.xlane.xlu0 %2050 }
0x1062   :  { %v2055_v25 = vsub.f32 %v2041_v6, %v2051_v22 }
0x1063   :  { %v2059_v26 = vmul.f32 1.442695, %v2056_v20 }
0x1064   :  { %v2057_v21 = vmul.f32 1.442695, %v2055_v25  ;;  %v1957_v25 = vld [vmem:[#allocation9 + $0x28] sm:$0xff] }
0x1065   :  { %4480 = vpow2.f32 %v2059_v26  ;;  %v1956_v26 = vld [vmem:[#allocation9 + $0x20] sm:$0xff] }
0x1066   :  { %4482 = vpow2.f32 %v2057_v21 }
0x1069   :  { %v2251_v23 = vpop.xlane.xlu0 %2250 }
0x106a   :  { %v2255_v27 = vsub.f32 %v2241_v11, %v2251_v23 }
0x106c   :  { %v2257_v28 = vmul.f32 1.442695, %v2255_v27 }
0x106d   :  { %v2254_v29 = vpop.xlane.xlu0 %2253 }
0x106e   :  { %4484 = vpow2.f32 %v2257_v28  ;;  %v2256_v30 = vsub.f32 %v2246_v18, %v2254_v29 }
0x106f   :  { %v4481_v32 = vpop.eup %4480 }
0x1070   :  { %v4483_v33 = vpop.eup %4482  ;;  %v2259_v34 = vmul.f32 1.442695, %v2256_v30  ;;  %v2064_v35 = vsel %vm530_vm12, %v4481_v32, 0.0 }
0x1071   :  { %2065 = vadd.xlane.f32.xlu0 %v2064_v35  ;;  %v2061_v36 = vsel %vm530_vm12, %v4483_v33, 0.0 }
0x1072   :  { %4486 = vpow2.f32 %v2259_v34  ;;  %2062 = vadd.xlane.f32.xlu1 %v2061_v36 }
0x1078   :  { %v4485_v37 = vpop.eup %4484 }
0x1079   :  { %v2261_v38 = vsel %vm530_vm12, %v4485_v37, 0.0 }
0x107a   :  { %2262 = vadd.xlane.f32.xlu1 %v2261_v38 }
0x107c   :  { %v4487_v39 = vpop.eup %4486 }
0x107d   :  { %v2264_v41 = vsel %vm530_vm12, %v4487_v39, 0.0 }
0x107e   :  { %2265 = vadd.xlane.f32.xlu0 %v2264_v41 }
0x108b   :  { %4406 = vrot.lane.b32.xlu1 %v5173_v50, %s4706_s22 }
0x108f   :  { %4416 = vrot.lane.b32.xlu1 %v5173_v50, %s4705_s5 }
0x1093   :  { %2803 = vrot.lane.b32.xlu1 %v5167_v48, %s4707_s28 }
0x1094   :  { %4411 = vrot.lane.b32.xlu0 %v5173_v50, %s4704_s3 }
0x1098   :  { %2805 = vrot.lane.b32.xlu0 %v5165_v45, %s4707_s28 }
0x10b7   :  { %2612 = vmax.xlane.f32.xlu1 %v2611_v51  ;;  %2615 = vmax.xlane.f32.xlu0 %v2614_v52 }
0x10fe   :  { %v2066_v54 = vpop.xlane.xlu0 %2065 }
0x10ff   :  { %v2063_v53 = vpop.xlane.xlu1 %2062 }
0x1100   :  { %4488 = vrcp.f32 %v2063_v53 }
0x1101   :  { %4490 = vrcp.f32 %v2066_v54 }
0x1107   :  { %v2263_v48 = vpop.xlane.xlu1 %2262 }
0x1108   :  { %4492 = vrcp.f32 %v2263_v48 }
0x110a   :  { %v4489_v55 = vpop.eup %4488 }
0x110b   :  { %v4407_v56 = vpop.permute.xlu1 %4406  ;;  %v2266_v57 = vpop.xlane.xlu0 %2265  ;;  %v2069_v45 = vmul.f32 %v4489_v55, %v4483_v33  ;;  %v1958_v55 = vld [vmem:[#allocation9 + $0x30] sm:$0xff] }
0x110c   :  { %v4409_v58 = vunpack.i.h.bf16 %v4407_v56  ;;  %v4408_v42 = vunpack.i.l.bf16 %v4407_v56  ;;  %4494 = vrcp.f32 %v2266_v57  ;;  %v4491_v59 = vpop.eup %4490 }
0x110d   :  { %4040 = vmatprep.mubr.msk.f32.mxu1 %vm530_vm12, %v2069_v45  ;;  %v2070_v3 = vmul.f32 %v4491_v59, %v4481_v32 }
0x110e   :  { %v4245_v43 = vpack.c.bf16 %v4409_v58, %v4408_v42 }
0x110f   :  { %v4417_v60 = vpop.permute.xlu1 %4416  ;;  %v4412_v61 = vpop.permute.xlu0 %4411 }
0x1110   :  { %v4419_v62 = vunpack.i.h.bf16 %v4417_v60  ;;  %v4418_v63 = vunpack.i.l.bf16 %v4417_v60  ;;  %v4414_v0 = vunpack.i.h.bf16 %v4412_v61  ;;  %v4413_v1 = vunpack.i.l.bf16 %v4412_v61  ;;  %4246 = vmatprep.subr.bf16.mxu1 %v4245_v43 }
0x1111   :  { %4248 = vmatpush3.bf16.msra.mxu1 %v4245_v43 }
0x1112   :  { %v4493_v2 = vpop.eup %4492  ;;  %v4269_v4 = vpack.c.bf16 %v4419_v62, %v4418_v63  ;;  %v4255_v5 = vpack.c.bf16 %v4414_v0, %v4413_v1 }
0x1113   :  { %v2804_v6 = vpop.permute.xlu1 %2803  ;;  %v2269_v7 = vmul.f32 %v4493_v2, %v4485_v37  ;;  %v2806_v10 = vpop.permute.xlu0 %2805 }
0x1114   :  { %4041 = vmatmul.mubr.msk.f32.vlgmr.msra.gmra.mrb[14].mxu1 %vm530_vm12, %v2070_v3  ;;  %4256 = vmatprep.subr.bf16.mxu1 %v4255_v5 }
0x1115   :  { %4271 = vmatprep.subr.msk.bf16.mxu0 %vm5017_vm11, %v4269_v4  ;;  %4090 = vmatprep.mubr.msk.f32.mxu0 %vm208_vm8, %v2804_v6 }
0x1116   :  { %v4495_v8 = vpop.eup %4494  ;;  %4258 = vmatpush3.bf16.msra.mxu1 %v4255_v5  ;;  %4054 = vmatprep.mubr.msk.f32.mxu1 %vm530_vm12, %v2269_v7  ;;  %v1959_v7 = vld [vmem:[#allocation9 + $0x38] sm:$0xff] }
0x1117   :  { %v2270_v9 = vmul.f32 %v4495_v8, %v4487_v39  ;;  %4274 = vmatpush3.bf16.xpose.msk.msra.mxu0 %vm5017_vm11, %v4269_v4  ;;  %4057 = vmatprep.subr.mxu1 %v1957_v25  ;;  %v4524_v39 = vld [vmem:[#allocation6] sm:$0xff] }
0x1119   :  { %4055 = vmatmul.mubr.msk.f32.vlgmr.msra.gmra.mrb[16].mxu1 %vm530_vm12, %v2270_v9 }
0x111a   :  { %4058 = vmatpush3.msra.mxu1 %v1957_v25 }
0x111b   :  { %4062 = vmatprep.subr.mxu1 %v1956_v26 }
0x111e   :  { %4091 = vmatmul.mubr.msk.f32.vlgmr.msra.gmra.mrb[20].mxu0 %vm208_vm8, %v2806_v10 }
0x1144   :  { %v2613_v11 = vpop.xlane.xlu1 %2612  ;;  %v2616_v18 = vpop.xlane.xlu0 %2615 }
0x1145   :  { %v2617_v15 = vsub.f32 %v2603_v46, %v2613_v11  ;;  %v2618_v12 = vsub.f32 %v2608_v44, %v2616_v18  ;;  %v4525_v44 = vld [vmem:[#allocation6 + $0x8] sm:$0xff] }
0x1147   :  { %v2619_v13 = vmul.f32 1.442695, %v2617_v15  ;;  %v2621_v14 = vmul.f32 1.442695, %v2618_v12  ;;  %v3719_v15 = vld [vmem:[%s5366_s7 + $0x1] ss:$0 sm:$0xff] }
0x1149   :  { %4496 = vpow2.f32 %v2619_v13 }
0x114a   :  { %4498 = vpow2.f32 %v2621_v14 }
0x1153   :  { %v4497_v19 = vpop.eup %4496 }
0x1154   :  { %v4499_v20 = vpop.eup %4498  ;;  %v2623_v22 = vsel %vm530_vm12, %v4497_v19, 0.0 }
0x1155   :  { %2624 = vadd.xlane.f32.xlu0 %v2623_v22  ;;  %v2626_v31 = vsel %vm530_vm12, %v4499_v20, 0.0 }
0x1156   :  { %2627 = vadd.xlane.f32.xlu1 %v2626_v31 }
0x116b   :  { %4421 = vrot.lane.b32.xlu0 %v5173_v50, %s4708_s1 }
0x11e2   :  { %v2625_v21 = vpop.xlane.xlu0 %2624 }
0x11e3   :  { %v2628_v29 = vpop.xlane.xlu1 %2627  ;;  %4500 = vrcp.f32 %v2625_v21 }
0x11e4   :  { %4502 = vrcp.f32 %v2628_v29 }
0x11e6   :  { %v4422_v27 = vpop.permute.xlu0 %4421 }
0x11e7   :  { %v4042_v23 = vpop.f32.mrb[14].mxu1  ;;  %v4424_v30 = vunpack.i.h.bf16 %v4422_v27  ;;  %v4423_v32 = vunpack.i.l.bf16 %v4422_v27 }
0x11e8   :  { %v2149_v28 = vpop.f32.mrb[15].mxu1 }
0x11e9   :  { %v4265_v35 = vpack.c.bf16 %v4424_v30, %v4423_v32 }
0x11ec   :  { %v4056_v33 = vpop.f32.mrb[16].mxu1 }
0x11ed   :  { %v2349_v34 = vpop.f32.mrb[17].mxu1  ;;  %v4501_v38 = vpop.eup %4500 }
0x11ee   :  { %4059 = vmatprep.mubr.msk.f32.mxu1 %vm208_vm8, %v2349_v34  ;;  %v4503_v52 = vpop.eup %4502  ;;  %v2631_v53 = vmul.f32 %v4501_v38, %v4497_v19  ;;  %v3725_v34 = vld [vmem:[%s5367_s8 + $0x28] sm:$0xff] }
0x11ef   :  { %4060 = vmatmul.mubr.msk.f32.vlgmr.msra.gmra.mrb[18].mxu1 %vm208_vm8, %v4056_v33  ;;  %v2632_v54 = vmul.f32 %v4503_v52, %v4499_v20 }
0x11f0   :  { %4063 = vmatpush3.msra.mxu1 %v1956_v26  ;;  %4064 = vmatprep.mubr.msk.f32.mxu1 %vm208_vm8, %v2149_v28 }
0x11f1   :  { %v4092_v36 = vpop.f32.mrb[20].mxu0  ;;  %4266 = vmatprep.subr.bf16.mxu1 %v4265_v35 }
0x11f2   :  { %v2885_v37 = vpop.f32.mrb[21].mxu0  ;;  %v2891_v46 = vadd.f32 %v4525_v44, %v4092_v36  ;;  %v3726_v36 = vld [vmem:[%s5367_s8 + $0x30] sm:$0xff] }
0x11f3   :  { %v2886_v41 = vadd.f32 %v4524_v39, %v2885_v37  ;;  %v3727_v37 = vld [vmem:[%s5367_s8 + $0x38] sm:$0xff]  ;;  %v3241_v39 = vld [vmem:[#allocation10 + $0x40] sm:$0xff]  ;;  %v3243_v44 = vld [vmem:[#allocation10 + $0x50] sm:$0xff] }
0x11f4   :  { %v2897_v48 = vsel %vm530_vm12, %v2891_v46, -inf  ;;  %v4283_v38 = vpack.c.bf16 %v3727_v37, %v3726_v36 }
0x11f5   :  { %v2894_v51 = vsel %vm530_vm12, %v2886_v41, -inf }
0x11f6   :  { %2895 = vmax.xlane.f32.xlu1 %v2894_v51  ;;  %v3244_v51 = vld [vmem:[#allocation10 + $0x58] sm:$0xff] }
0x11f7   :  { %4065 = vmatmul.mubr.msk.f32.vlgmr.msra.gmra.mrb[18].mxu1 %vm208_vm8, %v4042_v23  ;;  %v4291_v52 = vpack.c.bf16 %v3244_v51, %v3243_v44 }
0x11f8   :  { %4268 = vmatpush3.bf16.msra.mxu1 %v4265_v35  ;;  %4078 = vmatprep.mubr.msk.f32.mxu1 %vm530_vm12, %v2631_v53  ;;  %v3245_v53 = vld [vmem:[#allocation10 + $0x60] sm:$0xff] }
0x11f9   :  { %4081 = vmatprep.subr.mxu1 %v1958_v55 }
0x11fa   :  { %2898 = vmax.xlane.f32.xlu1 %v2897_v48 }
0x11fb   :  { %4079 = vmatmul.mubr.msk.f32.vlgmr.msra.gmra.mrb[20].mxu1 %vm530_vm12, %v2632_v54  ;;  %v3246_v54 = vld [vmem:[#allocation10 + $0x68] sm:$0xff] }
0x11fc   :  { %4082 = vmatpush3.msra.mxu1 %v1958_v55  ;;  %v4295_v48 = vpack.c.bf16 %v3246_v54, %v3245_v53 }
0x1283   :  { %v2896_v56 = vpop.xlane.xlu1 %2895 }
0x1284   :  { %v2900_v57 = vsub.f32 %v2886_v41, %v2896_v56  ;;  %v3242_v41 = vld [vmem:[#allocation10 + $0x48] sm:$0xff] }
0x1286   :  { %v2902_v42 = vmul.f32 1.442695, %v2900_v57 }
0x1287   :  { %v2899_v45 = vpop.xlane.xlu1 %2898 }
0x1288   :  { %v2901_v58 = vsub.f32 %v2891_v46, %v2899_v45  ;;  %v4287_v46 = vpack.c.bf16 %v3242_v41, %v3241_v39  ;;  %v3738_v41 = vld [vmem:[%s5373_s14 + $0x1] ss:$0 sm:$0xff] }
0x128a   :  { %v2904_v43 = vmul.f32 1.442695, %v2901_v58 }
0x128c   :  { %4504 = vpow2.f32 %v2904_v43 }
0x128d   :  { %4506 = vpow2.f32 %v2902_v42 }
0x1296   :  { %v4505_v59 = vpop.eup %4504 }
0x1297   :  { %v2909_v60 = vsel %vm530_vm12, %v4505_v59, 0.0  ;;  %v4507_v61 = vpop.eup %4506 }
0x1298   :  { %2910 = vadd.xlane.f32.xlu1 %v2909_v60  ;;  %v2906_v62 = vsel %vm530_vm12, %v4507_v61, 0.0 }
0x129c   :  { %2907 = vadd.xlane.f32.xlu1 %v2906_v62 }
0x12ad   :  { %4426 = vrot.lane.b32.xlu1 %v5173_v50, %s5409_s0 }
0x12ce   :  { %v4080_v63 = vpop.f32.mrb[20].mxu1 }
0x12cf   :  { %v2711_v0 = vpop.f32.mrb[21].mxu1 }
0x12d0   :  { %4083 = vmatprep.mubr.msk.f32.mxu1 %vm208_vm8, %v2711_v0 }
0x12d1   :  { %4084 = vmatmul.mubr.msk.f32.vlgmr.msra.gmra.mrb[18].mxu1 %vm208_vm8, %v4080_v63 }
0x1325   :  { %v2911_v1 = vpop.xlane.xlu1 %2910 }
0x1326   :  { %4508 = vrcp.f32 %v2911_v1 }
0x1329   :  { %v2908_v2 = vpop.xlane.xlu1 %2907 }
0x132a   :  { %4510 = vrcp.f32 %v2908_v2 }
0x132d   :  { %v4427_v3 = vpop.permute.xlu1 %4426 }
0x132e   :  { %v4429_v4 = vunpack.i.h.bf16 %v4427_v3  ;;  %v4428_v5 = vunpack.i.l.bf16 %v4427_v3 }
0x1330   :  { %v4275_v6 = vpack.c.bf16 %v4429_v4, %v4428_v5  ;;  %v4509_v8 = vpop.eup %4508  ;;  %v3247_v4 = vld [vmem:[#allocation10 + $0x70] sm:$0xff]  ;;  %v3248_v5 = vld [vmem:[#allocation10 + $0x78] sm:$0xff] }
0x1331   :  { %v2915_v10 = vmul.f32 %v4509_v8, %v4505_v59  ;;  %v3722_v59 = vld [vmem:[%s5371_s12 + $0x1] ss:$0 sm:$0xff] }
0x1332   :  { %4276 = vmatprep.subr.bf16.mxu1 %v4275_v6 }
0x1333   :  { %4278 = vmatpush3.bf16.msra.mxu1 %v4275_v6  ;;  %v4299_v6 = vpack.c.bf16 %v3248_v5, %v3247_v4  ;;  %v3432_v4 = vld [vmem:[%s5377_s18 + $0x10] sm:$0xff]  ;;  %v3433_v5 = vld [vmem:[%s5377_s18 + $0x18] sm:$0xff] }
0x1334   :  { %v4511_v9 = vpop.eup %4510  ;;  %4100 = vmatprep.subr.mxu1 %v1959_v7 }
0x1335   :  { %v2914_v50 = vmul.f32 %v4511_v9, %v4507_v61  ;;  %v3723_v61 = vld [vmem:[%s5372_s13 + $0x1] ss:$0 sm:$0xff] }
0x1337   :  { %4097 = vmatprep.mubr.msk.f32.mxu1 %vm530_vm12, %v2914_v50 }
0x1338   :  { %4098 = vmatmul.mubr.msk.f32.vlgmr.msra.gmra.mrb[22].mxu1 %vm530_vm12, %v2915_v10 }
0x1339   :  { %4101 = vmatpush3.msra.mxu1 %v1959_v7  ;;  %v3729_v7 = vld [vmem:[%s5368_s9 + $0x1] ss:$0 sm:$0xff] }
0x133a   :  { %4288 = vmatprep.subr.bf16.mxu1 %v4287_v46 }
0x140b   :  { %v4099_v11 = vpop.f32.mrb[22].mxu1 }
0x140c   :  { %v2994_v18 = vpop.f32.mrb[23].mxu1 }
0x140d   :  { %4102 = vmatprep.mubr.msk.f32.mxu1 %vm208_vm8, %v2994_v18 }
0x140e   :  { %4103 = vmatmul.mubr.msk.f32.vlgmr.msra.gmra.mrb[18].mxu1 %vm208_vm8, %v4099_v11 }
0x140f   :  { %4290 = vmatpush3.bf16.msra.mxu1 %v4287_v46  ;;  %v3739_v46 = vld [vmem:[%s5374_s15 + $0x1] ss:$0 sm:$0xff] }
0x1410   :  { %4292 = vmatprep.subr.bf16.mxu1 %v4291_v52 }
0x1413   :  { %4294 = vmatpush3.bf16.msra.mxu1 %v4291_v52 }
0x1414   :  { %4296 = vmatprep.subr.bf16.mxu1 %v4295_v48 }
0x1417   :  { %4298 = vmatpush3.bf16.msra.mxu1 %v4295_v48 }
0x1418   :  { %4300 = vmatprep.subr.bf16.mxu1 %v4299_v6 }
0x141b   :  { %4302 = vmatpush3.bf16.msra.mxu1 %v4299_v6  ;;  %v4307_v6 = vpack.c.bf16 %v3433_v5, %v3432_v4 }
0x14e1   :  { %v4104_v12 = vpop.f32.mrb[18].mxu1 }
0x14e2   :  { %v3095_v13 = vadd.f32 %v4104_v12, %v3719_v15  ;;  %v3075_v14 = vpop.f32.mrb[19].mxu1 }
0x14e3   :  { %v3094_v19 = vadd.f32 %v3719_v15, %v3075_v14  ;;  %v3733_v15 = vld [vmem:[%s5370_s11 + $0x1] ss:$0 sm:$0xff] }
0x14e4   :  { %v3097_v20 = vadd.f32 %v3095_v13, %v5158_v40 }
0x14e5   :  { %v3096_v22 = vadd.f32 %v3094_v19, %v5154_v24  ;;  %v3724_v24 = vld [vmem:[%s5367_s8 + $0x20] sm:$0xff]  ;;  %s5410_s8 = sld [smem:[#allocation24_spill]] }
0x14e6   :  { %v3105_v31 = vsel %vm355_vm10, %v3097_v20, 0.0  ;;  %v4279_v35 = vpack.c.bf16 %v3725_v34, %v3724_v24 }
0x14e7   :  { %3106 = vadd.xlane.f32.xlu1 %v3105_v31  ;;  %v3102_v25 = vsel %vm355_vm10, %v3096_v22, 0.0 }
0x14e8   :  { %3103 = vadd.xlane.f32.xlu0 %v3102_v25  ;;  %4280 = vmatprep.subr.bf16.mxu0 %v4279_v35 }
0x14e9   :  { %4282 = vmatpush3.bf16.msra.mxu0 %v4279_v35 }
0x14ea   :  { %4284 = vmatprep.subr.bf16.mxu0 %v4283_v38 }
0x14ed   :  { %4286 = vmatpush3.bf16.msra.mxu0 %v4283_v38 }
0x1574   :  { %v3107_v26 = vpop.xlane.xlu1 %3106 }
0x1575   :  { %v3109_v21 = vmul.f32 0.03125, %v3107_v26  ;;  %v3104_v23 = vpop.xlane.xlu0 %3103 }
0x1576   :  { %v3108_v27 = vmul.f32 0.03125, %v3104_v23 }
0x1577   :  { %v3111_v28 = vsub.f32 %v3097_v20, %v3109_v21 }
0x1578   :  { %v3110_v29 = vsub.f32 %v3096_v22, %v3108_v27 }
0x1579   :  { %v3113_v33 = vmul.f32 %v3111_v28, %v3111_v28 }
0x157a   :  { %v3112_v30 = vmul.f32 %v3110_v29, %v3110_v29 }
0x157b   :  { %v3117_v40 = vsel %vm355_vm10, %v3113_v33, 0.0 }
0x157c   :  { %v3114_v32 = vsel %vm355_vm10, %v3112_v30, 0.0 }
0x157d   :  { %3115 = vadd.xlane.f32.xlu0 %v3114_v32 }
0x1581   :  { %3118 = vadd.xlane.f32.xlu0 %v3117_v40 }
0x160a   :  { %v3116_v55 = vpop.xlane.xlu0 %3115 }
0x160b   :  { %v3120_v56 = vmul.f32 0.03125, %v3116_v55 }
0x160d   :  { %v3122_v57 = vadd.f32 1e-05, %v3120_v56 }
0x160e   :  { %v3119_v45 = vpop.xlane.xlu0 %3118 }
0x160f   :  { %4512 = vrsqrt.f32 %v3122_v57  ;;  %v3121_v58 = vmul.f32 0.03125, %v3119_v45 }
0x1611   :  { %v3123_v42 = vadd.f32 1e-05, %v3121_v58 }
0x1613   :  { %4514 = vrsqrt.f32 %v3123_v42 }
0x1619   :  { %v4513_v43 = vpop.eup %4512 }
0x161a   :  { %v3126_v60 = vmul.f32 %v4513_v43, %v3110_v29 }
0x161c   :  { %v3134_v62 = vmul.f32 %v3722_v59, %v3126_v60 }
0x161d   :  { %v4515_v63 = vpop.eup %4514 }
0x161e   :  { %v3127_v0 = vmul.f32 %v4515_v63, %v3111_v28  ;;  %v3142_v1 = vadd.f32 %v3723_v61, %v3134_v62 }
0x1620   :  { %v3135_v2 = vmul.f32 %v3722_v59, %v3127_v0  ;;  %4113 = vmatprep.mubr.msk.f32.mxu0 %vm355_vm10, %v3142_v1 }
0x1622   :  { %v3143_v3 = vadd.f32 %v3723_v61, %v3135_v2  ;;  %v3431_v2 = vld [vmem:[%s5377_s18 + $0x8] sm:$0xff] }
0x1624   :  { %4114 = vmatmul.mubr.msk.f32.vlgmr.msra.gmra.mrb[22].mxu0 %vm355_vm10, %v3143_v3 }
0x16f7   :  { %v4115_v8 = vpop.f32.mrb[22].mxu0 }
0x16f8   :  { %v3235_v9 = vadd.f32 %v4115_v8, %v3729_v7  ;;  %v3229_v50 = vpop.f32.mrb[23].mxu0 }
0x16f9   :  { %v3230_v10 = vadd.f32 %v3729_v7, %v3229_v50 }
0x16fa   :  { %v3239_v18 = vmax.f32 %v3235_v9, 0.0 }
0x16fb   :  { %v3238_v11 = vmax.f32 %v3230_v10, 0.0 }
0x16fd   :  { %4132 = vmatprep.mubr.msk.f32.mxu1 %vm1733_vm13, %v3238_v11 }
0x16fe   :  { %4133 = vmatmul.mubr.msk.f32.vlgmr.msra.gmra.mrb[24].mxu1 %vm1733_vm13, %v3239_v18 }
0x17d1   :  { %v4134_v12 = vpop.f32.mrb[24].mxu1 }
0x17d2   :  { %v3329_v13 = vpop.f32.mrb[25].mxu1  ;;  %v3335_v14 = vadd.f32 %v4134_v12, %v3733_v15 }
0x17d3   :  { %v3330_v19 = vadd.f32 %v3733_v15, %v3329_v13  ;;  %v3740_v15 = vld [vmem:[%s5375_s16] ss:$0 sm:$0xff] }
0x17d4   :  { %v3339_v31 = vadd.f32 %v3335_v14, %v3143_v3  ;;  %v3741_v13 = vld [vmem:[%s5376_s17] ss:$0 sm:$0xff] }
0x17d5   :  { %v3338_v20 = vadd.f32 %v3330_v19, %v3142_v1  ;;  %v3430_v1 = vld [vmem:[%s5377_s18] sm:$0xff] }
0x17d6   :  { %v3347_v25 = vsel %vm355_vm10, %v3339_v31, 0.0  ;;  %v4303_v3 = vpack.c.bf16 %v3431_v2, %v3430_v1 }
0x17d7   :  { %v3344_v22 = vsel %vm355_vm10, %v3338_v20, 0.0 }
0x17d8   :  { %3345 = vadd.xlane.f32.xlu0 %v3344_v22  ;;  %4304 = vmatprep.subr.bf16.mxu0 %v4303_v3 }
0x17d9   :  { %4306 = vmatpush3.bf16.msra.mxu0 %v4303_v3 }
0x17da   :  { %4308 = vmatprep.subr.bf16.mxu0 %v4307_v6 }
0x17dc   :  { %3348 = vadd.xlane.f32.xlu0 %v3347_v25 }
0x17dd   :  { %4310 = vmatpush3.bf16.msra.mxu0 %v4307_v6 }
0x1865   :  { %v3346_v26 = vpop.xlane.xlu0 %3345 }
0x1866   :  { %v3350_v21 = vmul.f32 0.03125, %v3346_v26  ;;  %v3522_v26 = vld [vmem:[#allocation12] sm:$0xff] }
0x1868   :  { %v3352_v23 = vsub.f32 %v3338_v20, %v3350_v21  ;;  %v3525_v21 = vld [vmem:[%s5380_s21 + $0x8] sm:$0xff] }
0x1869   :  { %v3349_v27 = vpop.xlane.xlu0 %3348 }
0x186a   :  { %v3351_v28 = vmul.f32 0.03125, %v3349_v27  ;;  %v3354_v29 = vmul.f32 %v3352_v23, %v3352_v23  ;;  %v4710_v27 = vmov 0  }
0x186b   :  { %4431 = vset.pattern.permute.xlu1 %v4710_v27  ;;  %4430 = vset.pattern.permute.xlu0 %v4710_v27 }
0x186c   :  { %v3353_v30 = vsub.f32 %v3339_v31, %v3351_v28  ;;  %v3356_v32 = vsel %vm355_vm10, %v3354_v29, 0.0  ;;  %v3742_v28 = vld [vmem:[%s5410_s8] ss:$0 sm:$0xff] }
0x186d   :  { %3357 = vadd.xlane.f32.xlu0 %v3356_v32 }
0x186e   :  { %v3355_v33 = vmul.f32 %v3353_v30, %v3353_v30 }
0x1870   :  { %v3359_v40 = vsel %vm355_vm10, %v3355_v33, 0.0 }
0x1871   :  { %3360 = vadd.xlane.f32.xlu1 %v3359_v40 }
0x18fa   :  { %v3358_v24 = vpop.xlane.xlu0 %3357 }
0x18fb   :  { %v3362_v34 = vmul.f32 0.03125, %v3358_v24  ;;  %v3523_v24 = vld [vmem:[#allocation12 + $0x8] sm:$0xff] }
0x18fd   :  { %v3364_v35 = vadd.f32 1e-05, %v3362_v34 }
0x18fe   :  { %v3361_v36 = vpop.xlane.xlu1 %3360 }
0x18ff   :  { %4516 = vrsqrt.f32 %v3364_v35  ;;  %v3363_v37 = vmul.f32 0.03125, %v3361_v36 }
0x1901   :  { %v3365_v38 = vadd.f32 1e-05, %v3363_v37 }
0x1903   :  { %4518 = vrsqrt.f32 %v3365_v38 }
0x1909   :  { %v4517_v39 = vpop.eup %4516 }
0x190a   :  { %v3368_v44 = vmul.f32 %v4517_v39, %v3352_v23  ;;  %v3524_v23 = vld [vmem:[%s5380_s21] sm:$0xff] }
0x190c   :  { %v3376_v51 = vmul.f32 %v3738_v41, %v3368_v44 }
0x190d   :  { %v4519_v52 = vpop.eup %4518 }
0x190e   :  { %v3384_v53 = vadd.f32 %v3739_v46, %v3376_v51  ;;  %v3369_v54 = vmul.f32 %v4519_v52, %v3353_v30 }
0x1910   :  { %v3388_v48 = vsel %vm355_vm10, %v3384_v53, 0.0  ;;  %v3377_v55 = vmul.f32 %v3738_v41, %v3369_v54 }
0x1911   :  { %3389 = vadd.xlane.f32.xlu0 %v3388_v48 }
0x1912   :  { %v3385_v56 = vadd.f32 %v3739_v46, %v3377_v55 }
0x1914   :  { %v3391_v57 = vsel %vm355_vm10, %v3385_v56, 0.0 }
0x1915   :  { %3392 = vadd.xlane.f32.xlu1 %v3391_v57 }
0x199e   :  { %v3390_v45 = vpop.xlane.xlu0 %3389 }
0x199f   :  { %v3394_v58 = vmul.f32 0.03125, %v3390_v45 }
0x19a1   :  { %v3396_v42 = vsub.f32 %v3384_v53, %v3394_v58 }
0x19a2   :  { %v3393_v43 = vpop.xlane.xlu1 %3392 }
0x19a3   :  { %v3395_v59 = vmul.f32 0.03125, %v3393_v43  ;;  %v3398_v60 = vmul.f32 %v3396_v42, %v3396_v42 }
0x19a5   :  { %v3397_v61 = vsub.f32 %v3385_v56, %v3395_v59  ;;  %v3400_v62 = vsel %vm355_vm10, %v3398_v60, 0.0 }
0x19a6   :  { %3401 = vadd.xlane.f32.xlu0 %v3400_v62 }
0x19a7   :  { %v3399_v63 = vmul.f32 %v3397_v61, %v3397_v61 }
0x19a9   :  { %v3403_v0 = vsel %vm355_vm10, %v3399_v63, 0.0 }
0x19aa   :  { %3404 = vadd.xlane.f32.xlu1 %v3403_v0 }
0x19bb   :  { %3533 = vperm.xlu1 %4431, %v3525_v21  }
0x19bc   :  { %3528 = vperm.xlu0 %4430, %v3524_v23  }
0x1a33   :  { %v3402_v7 = vpop.xlane.xlu0 %3401 }
0x1a34   :  { %v3406_v8 = vmul.f32 0.03125, %v3402_v7 }
0x1a36   :  { %v3408_v9 = vadd.f32 1e-05, %v3406_v8 }
0x1a37   :  { %v3405_v50 = vpop.xlane.xlu1 %3404 }
0x1a38   :  { %4520 = vrsqrt.f32 %v3408_v9  ;;  %v3407_v10 = vmul.f32 0.03125, %v3405_v50 }
0x1a3a   :  { %v3409_v11 = vadd.f32 1e-05, %v3407_v10 }
0x1a3b   :  { %v3534_v34 = vpop.permute.xlu1 %3533  ;;  %v3529_v35 = vpop.permute.xlu0 %3528 }
0x1a3c   :  { %4522 = vrsqrt.f32 %v3409_v11 }
0x1a42   :  { %v4521_v18 = vpop.eup %4520 }
0x1a43   :  { %v3412_v12 = vmul.f32 %v4521_v18, %v3396_v42 }
0x1a45   :  { %v3420_v14 = vmul.f32 %v3740_v15, %v3412_v12 }
0x1a46   :  { %v4523_v19 = vpop.eup %4522 }
0x1a47   :  { %v3413_v20 = vmul.f32 %v4523_v19, %v3397_v61  ;;  %v3428_v22 = vadd.f32 %v3741_v13, %v3420_v14 }
0x1a49   :  { %v3421_v31 = vmul.f32 %v3740_v15, %v3413_v20  ;;  %4143 = vmatprep.mubr.msk.f32.mxu0 %vm355_vm10, %v3428_v22 }
0x1a4b   :  { %v3429_v25 = vadd.f32 %v3741_v13, %v3421_v31 }
0x1a4d   :  { %4144 = vmatmul.mubr.msk.f32.vlgmr.msra.gmra.mrb[24].mxu0 %vm355_vm10, %v3429_v25 }
0x1a4e   :  { %4150 = vmatprep.mubr.msk.f32.mxu0 %vm530_vm12, %v3522_v26 }
0x1b20   :  { %v4145_v29 = vpop.f32.mrb[24].mxu0 }
0x1b21   :  { %v3519_v30 = vadd.f32 %v4145_v29, %v3742_v28  ;;  %v3513_v32 = vpop.f32.mrb[25].mxu0 }
0x1b22   :  { %v3514_v33 = vadd.f32 %v3742_v28, %v3513_v32 }
0x1b24   :  { %v4311_v40 = vpack.c.bf16 %v3519_v30, %v3514_v33 }
0x1b26   :  { %4312 = vmatprep.subr.bf16.mxu0 %v4311_v40 }
0x1b27   :  { %4314 = vmatpush3.bf16.msra.mxu0 %v4311_v40 }
0x1b2a   :  { %4151 = vmatmul.mubr.msk.f32.vlgmr.msra.gmra.mrb[26].mxu0 %vm530_vm12, %v3523_v24 }
0x1bfd   :  { %v4152_v36 = vpop.f32.mrb[26].mxu0 }
0x1bfe   :  { %v3614_v37 = vadd.f32 %v4152_v36, %v3534_v34  ;;  %v3608_v38 = vpop.f32.mrb[27].mxu0 }
0x1bff   :  { %v3609_v39 = vadd.f32 %v3608_v38, %v3529_v35 }
0x1c00   :  { %v3620_v41 = vmul.f32 %v3614_v37, %v4968_v47 }
0x1c01   :  { %v3617_v44 = vmul.f32 %v3609_v39, %v4971_v49 }
0x1c02   :  { %v3621_v46 = vadd.f32 %v3620_v41, %v4960_v16 }
0x1c03   :  { %v3618_v51 = vadd.f32 %v3617_v44, %v4962_v17 }
0x1c04   :  { %3747 = vst.msk [vmem:[%s5411_s6 + $0x8] sm:$0xff] %vm167_vm0, %v3621_v46 }
0x1c05   :  { %3619 = vst.msk [vmem:[%s5411_s6] sm:$0xff] %vm167_vm0, %v3618_v51 }
0x1c06   :  { %3628 = vsyncpa [#allocation3], 1 }
0x1c07   :  { %3629 = vsyncpa [#allocation5], 1 }
0x1c08   :  { %3630 = vsyncpa [#allocation8], 1 }
0x1c09   :  { %3631 = vsyncpa [#allocation11], 1 }

</bundles_post_ra>
